<compile_context>
chip_gen: v7x
topology: tpu7x:2x2x1
jax: 0.10.0
libtpu: 0.0.40
codegen_flags: <defaults>
</compile_context>

<pallas_src>
import functools

import jax
import jax.numpy as jnp
from jax.experimental import pallas as pl
from jax.experimental.pallas import tpu as pltpu


def _round_up(x, m):
    return (x + m - 1) // m * m


# ---------------------------------------------------------------------------
# Pallas kernel: fused matmul + BN affine (+ReLU) (+residual)
# ---------------------------------------------------------------------------
def _fused_matmul_kernel(*refs, relu, has_scale, has_res):
    it = iter(refs)
    x_ref = next(it)
    w_ref = next(it)
    scale_ref = next(it) if has_scale else None
    shift_ref = next(it)
    res_ref = next(it) if has_res else None
    o_ref = next(it)

    acc = jnp.dot(x_ref[...], w_ref[...], preferred_element_type=jnp.float32)
    if has_scale:
        out = acc * scale_ref[...] + shift_ref[...]
    else:
        out = acc + shift_ref[...]
    if relu:
        out = jnp.maximum(out, 0.0)
    if has_res:
        out = out + res_ref[...]
    o_ref[...] = out.astype(o_ref.dtype)


def fused_matmul(x, w, shift, scale=None, relu=False, res=None):
    """out = relu?((x @ w) * scale + shift) [+ res]

    x:[M,K], w:[K,Nout], scale/shift:[Nout], res:[M,Nout] or None.
    bf16 operands on the MXU, f32 accumulation, f32 result.
    """
    M, K = x.shape
    Kw, Nout = w.shape
    assert K == Kw
    N_pad = _round_up(Nout, 128)

    # bf16 operands for the MXU; epilogue terms stay f32.
    xb = x.astype(jnp.bfloat16)
    wb = jnp.pad(w, ((0, 0), (0, N_pad - Nout))).astype(jnp.bfloat16)
    shift_p = jnp.pad(shift, (0, N_pad - Nout)).reshape(1, N_pad).astype(jnp.float32)

    # Row tiling: activations are tiny here, so a single full-M tile per call
    # (block dim == full array dim -> no M-pad copy needed).
    if M <= 512:
        TM, M_pad = M, M
    else:
        TM = 512
        M_pad = _round_up(M, TM)
    if M_pad != M:
        xb = jnp.pad(xb, ((0, M_pad - M), (0, 0)))

    operands = [xb, wb]
    in_specs = [
        pl.BlockSpec((TM, K), lambda i: (i, 0)),      # activation row tile
        pl.BlockSpec((K, N_pad), lambda i: (0, 0)),   # full (padded) weight
    ]
    if scale is not None:
        scale_p = jnp.pad(scale, (0, N_pad - Nout)).reshape(1, N_pad).astype(jnp.float32)
        operands.append(scale_p)
        in_specs.append(pl.BlockSpec((1, N_pad), lambda i: (0, 0)))
    operands.append(shift_p)
    in_specs.append(pl.BlockSpec((1, N_pad), lambda i: (0, 0)))
    if res is not None:
        res_p = jnp.pad(res.astype(jnp.float32),
                        ((0, M_pad - M), (0, N_pad - Nout)))
        operands.append(res_p)
        in_specs.append(pl.BlockSpec((TM, N_pad), lambda i: (i, 0)))

    out = pl.pallas_call(
        functools.partial(_fused_matmul_kernel, relu=relu,
                          has_scale=scale is not None, has_res=res is not None),
        out_shape=jax.ShapeDtypeStruct((M_pad, N_pad), jnp.float32),
        grid_spec=pltpu.PrefetchScalarGridSpec(
            num_scalar_prefetch=0,
            grid=(M_pad // TM,),
            in_specs=in_specs,
            out_specs=pl.BlockSpec((TM, N_pad), lambda i: (i, 0)),
        ),
        compiler_params=pltpu.CompilerParams(
            dimension_semantics=("parallel",)),
    )(*operands)
    return out[:M, :Nout]


# ---------------------------------------------------------------------------
# Glue: BN folding + im2col helpers (plain JAX, tiny tensors)
# ---------------------------------------------------------------------------
def bn_fold(bias, gamma, beta, mean, var, eps=1e-5):
    scale = gamma / jnp.sqrt(var + eps)
    shift = beta + (bias - mean) * scale
    return scale, shift


def spectral_conv(z, w, b, bn, relu=True, res=None):
    """Conv3d(C->Cout,(7,1,1),pad(3,0,0)) + BN3d [+ReLU] [+res]. z:[N,D,H,W,C]."""
    N, D, H, W, C = z.shape
    zp = jnp.pad(z, ((0, 0), (3, 3), (0, 0), (0, 0), (0, 0)))
    cols = jnp.concatenate([zp[:, k:k + D] for k in range(7)], axis=-1)
    cols = cols.reshape(N * D * H * W, 7 * C)
    sc, sh = bn_fold(b, *bn)
    res_flat = None if res is None else res.reshape(N * D * H * W, -1)
    out = fused_matmul(cols, w, sh, scale=sc, relu=relu, res=res_flat)
    return out.reshape(N, D, H, W, w.shape[1])


def spatial_conv(z, w, b, bn, relu=True, res=None, pad=1):
    """Conv2d 3x3 + BN2d [+ReLU] [+res]. z:[N,H,W,C] channels-last."""
    N, H, W, C = z.shape
    zp = jnp.pad(z, ((0, 0), (pad, pad), (pad, pad), (0, 0))) if pad else z
    Ho, Wo = H + 2 * pad - 2, W + 2 * pad - 2
    cols = []
    for hh in range(3):
        for ww in range(3):
            cols.append(zp[:, hh:hh + Ho, ww:ww + Wo, :])
    cols = jnp.concatenate(cols, axis=-1).reshape(N * Ho * Wo, 9 * C)
    sc, sh = bn_fold(b, *bn)
    res_flat = None if res is None else res.reshape(N * Ho * Wo, -1)
    out = fused_matmul(cols, w, sh, scale=sc, relu=relu, res=res_flat)
    return out.reshape(N, Ho, Wo, w.shape[1])


# ---------------------------------------------------------------------------
# Deterministic synthetic parameters
# ---------------------------------------------------------------------------
def _dense(key, k_in, k_out, scale=0.05):
    k1, k2 = jax.random.split(key)
    w = scale * jax.random.normal(k1, (k_in, k_out), jnp.float32)
    b = scale * jax.random.normal(k2, (k_out,), jnp.float32)
    return w, b


def _bn(key, c):
    k1, k2, k3, k4 = jax.random.split(key, 4)
    gamma = 1.0 + 0.1 * jax.random.normal(k1, (c,), jnp.float32)
    beta = 0.1 * jax.random.normal(k2, (c,), jnp.float32)
    mean = 0.1 * jax.random.normal(k3, (c,), jnp.float32)
    var = 1.0 + 0.1 * jax.random.uniform(k4, (c,), jnp.float32)
    return gamma, beta, mean, var


def init_params(key, spectral_channels, num_classes):
    D1 = (spectral_channels - 7) // 2 + 1        # depth after FE1 (stride 2, k=7)
    ks = jax.random.split(key, 20)
    p = {}
    # FE1: Conv3d(1->24,(7,1,1),stride(2,1,1)) + BN3d(24)
    p['fe1_w'], p['fe1_b'] = _dense(ks[0], 7, 24)
    p['fe1_bn'] = _bn(ks[1], 24)
    # spe_conv1 / spe_conv2: 2x [Conv3d(24->24,(7,1,1),pad(3,0,0)) + BN + ReLU]
    for i, name in enumerate(['spe1a', 'spe1b', 'spe2a', 'spe2b']):
        p[name + '_w'], p[name + '_b'] = _dense(ks[2 + 2 * i], 7 * 24, 24)
        p[name + '_bn'] = _bn(ks[3 + 2 * i], 24)
    # CF: Conv3d(24->128,(D1,1,1)) + BN3d(128)   (get_SSRN_channel(dataset) == D1)
    p['cf_w'], p['cf_b'] = _dense(ks[10], D1 * 24, 128)
    p['cf_bn'] = _bn(ks[11], 128)
    # FE2: Conv2d(128->24, 3x3, valid) + BN2d(24)
    p['fe2_w'], p['fe2_b'] = _dense(ks[12], 9 * 128, 24)
    p['fe2_bn'] = _bn(ks[13], 24)
    # spa_conv1: 2x [Conv2d(24->24,3x3,pad1) + BN + ReLU + Dropout(eval identity)]
    for i, name in enumerate(['spa1a', 'spa1b']):
        p[name + '_w'], p[name + '_b'] = _dense(ks[14 + 2 * i], 9 * 24, 24)
        p[name + '_bn'] = _bn(ks[15 + 2 * i], 24)
    # classifier: Linear(24 -> num_classes)
    p['cls_w'], p['cls_b'] = _dense(ks[18], 24, num_classes)
    return p


# ---------------------------------------------------------------------------
# Forward pass (SSRN, eval mode)
# ---------------------------------------------------------------------------
def ssrn_forward(x, params):
    """x: [N, C_spectral, 5, 5] (PyTorch NCHW); spectral dim becomes 3-D depth."""
    N, C, H, W = x.shape
    D1 = (C - 7) // 2 + 1
    xs = jnp.transpose(x, (0, 2, 3, 1))                          # [N, H, W, C]

    # FE1: Conv3d(1->24,(7,1,1),stride(2,1,1)) + BN3d (no ReLU)
    cols = jnp.stack([xs[..., 2 * d:2 * d + 7] for d in range(D1)], axis=3)
    cols = jnp.transpose(cols, (0, 3, 1, 2, 4)).reshape(N * D1 * H * W, 7)
    sc, sh = bn_fold(params['fe1_b'], *params['fe1_bn'])
    fe1 = fused_matmul(cols, params['fe1_w'], sh, scale=sc,
                       relu=False).reshape(N, D1, H, W, 24)

    # Spectral residual block 1  (residual add fused into 2nd conv epilogue)
    z = spectral_conv(fe1, params['spe1a_w'], params['spe1a_b'], params['spe1a_bn'])
    spe1_new = spectral_conv(z, params['spe1b_w'], params['spe1b_b'],
                             params['spe1b_bn'], res=fe1)
    # Spectral residual block 2
    z = spectral_conv(spe1_new, params['spe2a_w'], params['spe2a_b'], params['spe2a_bn'])
    spe2_new = spectral_conv(z, params['spe2b_w'], params['spe2b_b'],
                             params['spe2b_bn'], res=spe1_new)

    # CF: Conv3d(24->128,(D1,1,1)) + BN3d, then squeeze the collapsed depth dim
    cols = jnp.transpose(spe2_new, (0, 2, 3, 1, 4)).reshape(N * H * W, D1 * 24)
    sc, sh = bn_fold(params['cf_b'], *params['cf_bn'])
    cf = fused_matmul(cols, params['cf_w'], sh, scale=sc,
                      relu=False).reshape(N, H, W, 128)

    # FE2: Conv2d(128->24, 3x3, valid) + BN2d (no ReLU)  -> [N, 3, 3, 24]
    fe2 = spatial_conv(cf, params['fe2_w'], params['fe2_b'], params['fe2_bn'],
                       relu=False, pad=0)

    # Spatial residual block (Dropout2d = eval-mode identity)
    z = spatial_conv(fe2, params['spa1a_w'], params['spa1a_b'], params['spa1a_bn'],
                     relu=True, pad=1)
    spa_new = spatial_conv(z, params['spa1b_w'], params['spa1b_b'], params['spa1b_bn'],
                           relu=True, pad=1, res=fe2)            # [N, 3, 3, 24]

    # AvgPool2d(3) + squeeze + Linear(24->nc), folded into one bias-only matmul
    flat = spa_new.reshape(N, 3 * 3 * 24)
    w_cls = jnp.tile(params['cls_w'], (9, 1)) / 9.0              # [9*24, num_classes]
    out = fused_matmul(flat, w_cls, params['cls_b'], scale=None, relu=False)
    return out


# ---------------------------------------------------------------------------
if __name__ == "__main__":
    key = jax.random.PRNGKey(0)
    kx, kp = jax.random.split(key)

    # Small, shape-consistent example: batch=2, 16 spectral bands, 5x5 patch.
    # FE1 depth: (16-7)//2+1 = 5, CF depth-kernel = 5 -> squeeze to [N,128,5,5].
    N, C, H, W = 2, 16, 5, 5
    num_classes = 9

    x = jax.random.normal(kx, (N, C, H, W), jnp.float32)
    params = init_params(kp, C, num_classes)

    fwd = jax.jit(ssrn_forward)
    out = fwd(x, params)
    out = jax.block_until_ready(out)
    assert out.shape == (N, num_classes), out.shape
    assert bool(jnp.all(jnp.isfinite(out)))
    print("KERNEL_OK")
</pallas_src>

<mosaic_0001>
module attributes {stable_mosaic.version = 11 : i64} {
  func.func @_fused_matmul_kernel(%arg0: i32, %arg1: memref<250x7xbf16, #tpu.memory_space<vmem>>, %arg2: memref<7x128xbf16, #tpu.memory_space<vmem>>, %arg3: memref<1x128xf32, #tpu.memory_space<vmem>>, %arg4: memref<1x128xf32, #tpu.memory_space<vmem>>, %arg5: memref<250x128xf32, #tpu.memory_space<vmem>>) attributes {dimension_semantics = [#tpu.dimension_semantics<parallel>], iteration_bounds = array<i64: 1>, scalar_prefetch = 0 : i64, scratch_operands = 0 : i64, tpu.core_type = #tpu.core_type<tc>, window_params = [{transform_indices = @transform_0, window_bounds = array<i64: 250, 7>}, {pipeline_mode = #tpu.pipeline_mode<synchronous>, transform_indices = @transform_1, window_bounds = array<i64: 7, 128>}, {pipeline_mode = #tpu.pipeline_mode<synchronous>, transform_indices = @transform_2, window_bounds = array<i64: 1, 128>}, {pipeline_mode = #tpu.pipeline_mode<synchronous>, transform_indices = @transform_3, window_bounds = array<i64: 1, 128>}, {transform_indices = @transform_4, window_bounds = array<i64: 250, 128>}]} {
    %c0 = arith.constant 0 : index
    %c0_0 = arith.constant 0 : index
    %0 = vector.load %arg1[%c0, %c0_0] : memref<250x7xbf16, #tpu.memory_space<vmem>>, vector<250x7xbf16>
    %c0_1 = arith.constant 0 : index
    %c0_2 = arith.constant 0 : index
    %1 = vector.load %arg2[%c0_1, %c0_2] : memref<7x128xbf16, #tpu.memory_space<vmem>>, vector<7x128xbf16>
    %cst = arith.constant dense<0.000000e+00> : vector<250x128xf32>
    %2 = tpu.matmul %0, %1, %cst {dimension_numbers = #tpu.dot_dimension_numbers<[1], [0], [0], [1], [0, 0, 1, 1], [], []>} : vector<250x7xbf16>, vector<7x128xbf16>, vector<250x128xf32> -> vector<250x128xf32>
    %c0_3 = arith.constant 0 : index
    %c0_4 = arith.constant 0 : index
    %3 = vector.load %arg3[%c0_3, %c0_4] : memref<1x128xf32, #tpu.memory_space<vmem>>, vector<1x128xf32>
    %4 = vector.broadcast %3 : vector<1x128xf32> to vector<250x128xf32>
    %5 = arith.mulf %2, %4 : vector<250x128xf32>
    %c0_5 = arith.constant 0 : index
    %c0_6 = arith.constant 0 : index
    %6 = vector.load %arg4[%c0_5, %c0_6] : memref<1x128xf32, #tpu.memory_space<vmem>>, vector<1x128xf32>
    %7 = vector.broadcast %6 : vector<1x128xf32> to vector<250x128xf32>
    %8 = arith.addf %5, %7 : vector<250x128xf32>
    %c0_7 = arith.constant 0 : index
    %c0_8 = arith.constant 0 : index
    %9 = vector.load %arg5[%c0_7, %c0_8] : memref<250x128xf32, #tpu.memory_space<vmem>>, vector<250x128xf32>
    tpu.vector_store %arg5[%c0_7, %c0_8], %8 {strides = array<i32>} : memref<250x128xf32, #tpu.memory_space<vmem>>, vector<250x128xf32>,
    return
  }
  func.func @transform_0(%arg0: i32) -> (i32, i32) {
    %c0_i32 = arith.constant 0 : i32
    %c0_i32_0 = arith.constant 0 : i32
    return %arg0, %c0_i32 : i32, i32
  }
  func.func @transform_1(%arg0: i32) -> (i32, i32) {
    %c0_i32 = arith.constant 0 : i32
    %c0_i32_0 = arith.constant 0 : i32
    %c0_i32_1 = arith.constant 0 : i32
    return %c0_i32, %c0_i32_0 : i32, i32
  }
  func.func @transform_2(%arg0: i32) -> (i32, i32) {
    %c0_i32 = arith.constant 0 : i32
    %c0_i32_0 = arith.constant 0 : i32
    %c0_i32_1 = arith.constant 0 : i32
    return %c0_i32, %c0_i32_0 : i32, i32
  }
  func.func @transform_3(%arg0: i32) -> (i32, i32) {
    %c0_i32 = arith.constant 0 : i32
    %c0_i32_0 = arith.constant 0 : i32
    %c0_i32_1 = arith.constant 0 : i32
    return %c0_i32, %c0_i32_0 : i32, i32
  }
  func.func @transform_4(%arg0: i32) -> (i32, i32) {
    %c0_i32 = arith.constant 0 : i32
    %c0_i32_0 = arith.constant 0 : i32
    return %arg0, %c0_i32 : i32, i32
  }
}

module attributes {stable_mosaic.version = 11 : i64} {
  func.func @_fused_matmul_kernel(%arg0: i32, %arg1: memref<250x168xbf16, #tpu.memory_space<vmem>>, %arg2: memref<168x128xbf16, #tpu.memory_space<vmem>>, %arg3: memref<1x128xf32, #tpu.memory_space<vmem>>, %arg4: memref<1x128xf32, #tpu.memory_space<vmem>>, %arg5: memref<250x128xf32, #tpu.memory_space<vmem>>, %arg6: memref<250x128xf32, #tpu.memory_space<vmem>>) attributes {dimension_semantics = [#tpu.dimension_semantics<parallel>], iteration_bounds = array<i64: 1>, scalar_prefetch = 0 : i64, scratch_operands = 0 : i64, tpu.core_type = #tpu.core_type<tc>, window_params = [{transform_indices = @transform_0, window_bounds = array<i64: 250, 168>}, {pipeline_mode = #tpu.pipeline_mode<synchronous>, transform_indices = @transform_1, window_bounds = array<i64: 168, 128>}, {pipeline_mode = #tpu.pipeline_mode<synchronous>, transform_indices = @transform_2, window_bounds = array<i64: 1, 128>}, {pipeline_mode = #tpu.pipeline_mode<synchronous>, transform_indices = @transform_3, window_bounds = array<i64: 1, 128>}, {transform_indices = @transform_4, window_bounds = array<i64: 250, 128>}, {transform_indices = @transform_5, window_bounds = array<i64: 250, 128>}]} {
    %c0 = arith.constant 0 : index
    %c0_0 = arith.constant 0 : index
    %0 = vector.load %arg1[%c0, %c0_0] : memref<250x168xbf16, #tpu.memory_space<vmem>>, vector<250x168xbf16>
    %c0_1 = arith.constant 0 : index
    %c0_2 = arith.constant 0 : index
    %1 = vector.load %arg2[%c0_1, %c0_2] : memref<168x128xbf16, #tpu.memory_space<vmem>>, vector<168x128xbf16>
    %cst = arith.constant dense<0.000000e+00> : vector<250x128xf32>
    %2 = tpu.matmul %0, %1, %cst {dimension_numbers = #tpu.dot_dimension_numbers<[1], [0], [0], [1], [0, 0, 1, 1], [], []>} : vector<250x168xbf16>, vector<168x128xbf16>, vector<250x128xf32> -> vector<250x128xf32>
    %c0_3 = arith.constant 0 : index
    %c0_4 = arith.constant 0 : index
    %3 = vector.load %arg3[%c0_3, %c0_4] : memref<1x128xf32, #tpu.memory_space<vmem>>, vector<1x128xf32>
    %4 = vector.broadcast %3 : vector<1x128xf32> to vector<250x128xf32>
    %5 = arith.mulf %2, %4 : vector<250x128xf32>
    %c0_5 = arith.constant 0 : index
    %c0_6 = arith.constant 0 : index
    %6 = vector.load %arg4[%c0_5, %c0_6] : memref<1x128xf32, #tpu.memory_space<vmem>>, vector<1x128xf32>
    %7 = vector.broadcast %6 : vector<1x128xf32> to vector<250x128xf32>
    %8 = arith.addf %5, %7 : vector<250x128xf32>
    %cst_7 = arith.constant 0.000000e+00 : f32
    %9 = vector.broadcast %cst_7 : f32 to vector<250x128xf32>
    %10 = arith.maximumf %8, %9 : vector<250x128xf32>
    %c0_8 = arith.constant 0 : index
    %c0_9 = arith.constant 0 : index
    %11 = vector.load %arg5[%c0_8, %c0_9] : memref<250x128xf32, #tpu.memory_space<vmem>>, vector<250x128xf32>
    %12 = arith.addf %10, %11 : vector<250x128xf32>
    %c0_10 = arith.constant 0 : index
    %c0_11 = arith.constant 0 : index
    %13 = vector.load %arg6[%c0_10, %c0_11] : memref<250x128xf32, #tpu.memory_space<vmem>>, vector<250x128xf32>
    tpu.vector_store %arg6[%c0_10, %c0_11], %12 {strides = array<i32>} : memref<250x128xf32, #tpu.memory_space<vmem>>, vector<250x128xf32>,
    return
  }
  func.func @transform_0(%arg0: i32) -> (i32, i32) {
    %c0_i32 = arith.constant 0 : i32
    %c0_i32_0 = arith.constant 0 : i32
    return %arg0, %c0_i32 : i32, i32
  }
  func.func @transform_1(%arg0: i32) -> (i32, i32) {
    %c0_i32 = arith.constant 0 : i32
    %c0_i32_0 = arith.constant 0 : i32
    %c0_i32_1 = arith.constant 0 : i32
    return %c0_i32, %c0_i32_0 : i32, i32
  }
  func.func @transform_2(%arg0: i32) -> (i32, i32) {
    %c0_i32 = arith.constant 0 : i32
    %c0_i32_0 = arith.constant 0 : i32
    %c0_i32_1 = arith.constant 0 : i32
    return %c0_i32, %c0_i32_0 : i32, i32
  }
  func.func @transform_3(%arg0: i32) -> (i32, i32) {
    %c0_i32 = arith.constant 0 : i32
    %c0_i32_0 = arith.constant 0 : i32
    %c0_i32_1 = arith.constant 0 : i32
    return %c0_i32, %c0_i32_0 : i32, i32
  }
  func.func @transform_4(%arg0: i32) -> (i32, i32) {
    %c0_i32 = arith.constant 0 : i32
    %c0_i32_0 = arith.constant 0 : i32
    return %arg0, %c0_i32 : i32, i32
  }
  func.func @transform_5(%arg0: i32) -> (i32, i32) {
    %c0_i32 = arith.constant 0 : i32
    %c0_i32_0 = arith.constant 0 : i32
    return %arg0, %c0_i32 : i32, i32
  }
}

module attributes {stable_mosaic.version = 11 : i64} {
  func.func @_fused_matmul_kernel(%arg0: i32, %arg1: memref<250x168xbf16, #tpu.memory_space<vmem>>, %arg2: memref<168x128xbf16, #tpu.memory_space<vmem>>, %arg3: memref<1x128xf32, #tpu.memory_space<vmem>>, %arg4: memref<1x128xf32, #tpu.memory_space<vmem>>, %arg5: memref<250x128xf32, #tpu.memory_space<vmem>>) attributes {dimension_semantics = [#tpu.dimension_semantics<parallel>], iteration_bounds = array<i64: 1>, scalar_prefetch = 0 : i64, scratch_operands = 0 : i64, tpu.core_type = #tpu.core_type<tc>, window_params = [{transform_indices = @transform_0, window_bounds = array<i64: 250, 168>}, {pipeline_mode = #tpu.pipeline_mode<synchronous>, transform_indices = @transform_1, window_bounds = array<i64: 168, 128>}, {pipeline_mode = #tpu.pipeline_mode<synchronous>, transform_indices = @transform_2, window_bounds = array<i64: 1, 128>}, {pipeline_mode = #tpu.pipeline_mode<synchronous>, transform_indices = @transform_3, window_bounds = array<i64: 1, 128>}, {transform_indices = @transform_4, window_bounds = array<i64: 250, 128>}]} {
    %c0 = arith.constant 0 : index
    %c0_0 = arith.constant 0 : index
    %0 = vector.load %arg1[%c0, %c0_0] : memref<250x168xbf16, #tpu.memory_space<vmem>>, vector<250x168xbf16>
    %c0_1 = arith.constant 0 : index
    %c0_2 = arith.constant 0 : index
    %1 = vector.load %arg2[%c0_1, %c0_2] : memref<168x128xbf16, #tpu.memory_space<vmem>>, vector<168x128xbf16>
    %cst = arith.constant dense<0.000000e+00> : vector<250x128xf32>
    %2 = tpu.matmul %0, %1, %cst {dimension_numbers = #tpu.dot_dimension_numbers<[1], [0], [0], [1], [0, 0, 1, 1], [], []>} : vector<250x168xbf16>, vector<168x128xbf16>, vector<250x128xf32> -> vector<250x128xf32>
    %c0_3 = arith.constant 0 : index
    %c0_4 = arith.constant 0 : index
    %3 = vector.load %arg3[%c0_3, %c0_4] : memref<1x128xf32, #tpu.memory_space<vmem>>, vector<1x128xf32>
    %4 = vector.broadcast %3 : vector<1x128xf32> to vector<250x128xf32>
    %5 = arith.mulf %2, %4 : vector<250x128xf32>
    %c0_5 = arith.constant 0 : index
    %c0_6 = arith.constant 0 : index
    %6 = vector.load %arg4[%c0_5, %c0_6] : memref<1x128xf32, #tpu.memory_space<vmem>>, vector<1x128xf32>
    %7 = vector.broadcast %6 : vector<1x128xf32> to vector<250x128xf32>
    %8 = arith.addf %5, %7 : vector<250x128xf32>
    %cst_7 = arith.constant 0.000000e+00 : f32
    %9 = vector.broadcast %cst_7 : f32 to vector<250x128xf32>
    %10 = arith.maximumf %8, %9 : vector<250x128xf32>
    %c0_8 = arith.constant 0 : index
    %c0_9 = arith.constant 0 : index
    %11 = vector.load %arg5[%c0_8, %c0_9] : memref<250x128xf32, #tpu.memory_space<vmem>>, vector<250x128xf32>
    tpu.vector_store %arg5[%c0_8, %c0_9], %10 {strides = array<i32>} : memref<250x128xf32, #tpu.memory_space<vmem>>, vector<250x128xf32>,
    return
  }
  func.func @transform_0(%arg0: i32) -> (i32, i32) {
    %c0_i32 = arith.constant 0 : i32
    %c0_i32_0 = arith.constant 0 : i32
    return %arg0, %c0_i32 : i32, i32
  }
  func.func @transform_1(%arg0: i32) -> (i32, i32) {
    %c0_i32 = arith.constant 0 : i32
    %c0_i32_0 = arith.constant 0 : i32
    %c0_i32_1 = arith.constant 0 : i32
    return %c0_i32, %c0_i32_0 : i32, i32
  }
  func.func @transform_2(%arg0: i32) -> (i32, i32) {
    %c0_i32 = arith.constant 0 : i32
    %c0_i32_0 = arith.constant 0 : i32
    %c0_i32_1 = arith.constant 0 : i32
    return %c0_i32, %c0_i32_0 : i32, i32
  }
  func.func @transform_3(%arg0: i32) -> (i32, i32) {
    %c0_i32 = arith.constant 0 : i32
    %c0_i32_0 = arith.constant 0 : i32
    %c0_i32_1 = arith.constant 0 : i32
    return %c0_i32, %c0_i32_0 : i32, i32
  }
  func.func @transform_4(%arg0: i32) -> (i32, i32) {
    %c0_i32 = arith.constant 0 : i32
    %c0_i32_0 = arith.constant 0 : i32
    return %arg0, %c0_i32 : i32, i32
  }
}

module attributes {stable_mosaic.version = 11 : i64} {
  func.func @_fused_matmul_kernel(%arg0: i32, %arg1: memref<50x120xbf16, #tpu.memory_space<vmem>>, %arg2: memref<120x128xbf16, #tpu.memory_space<vmem>>, %arg3: memref<1x128xf32, #tpu.memory_space<vmem>>, %arg4: memref<1x128xf32, #tpu.memory_space<vmem>>, %arg5: memref<50x128xf32, #tpu.memory_space<vmem>>) attributes {dimension_semantics = [#tpu.dimension_semantics<parallel>], iteration_bounds = array<i64: 1>, scalar_prefetch = 0 : i64, scratch_operands = 0 : i64, tpu.core_type = #tpu.core_type<tc>, window_params = [{transform_indices = @transform_0, window_bounds = array<i64: 50, 120>}, {pipeline_mode = #tpu.pipeline_mode<synchronous>, transform_indices = @transform_1, window_bounds = array<i64: 120, 128>}, {pipeline_mode = #tpu.pipeline_mode<synchronous>, transform_indices = @transform_2, window_bounds = array<i64: 1, 128>}, {pipeline_mode = #tpu.pipeline_mode<synchronous>, transform_indices = @transform_3, window_bounds = array<i64: 1, 128>}, {transform_indices = @transform_4, window_bounds = array<i64: 50, 128>}]} {
    %c0 = arith.constant 0 : index
    %c0_0 = arith.constant 0 : index
    %0 = vector.load %arg1[%c0, %c0_0] : memref<50x120xbf16, #tpu.memory_space<vmem>>, vector<50x120xbf16>
    %c0_1 = arith.constant 0 : index
    %c0_2 = arith.constant 0 : index
    %1 = vector.load %arg2[%c0_1, %c0_2] : memref<120x128xbf16, #tpu.memory_space<vmem>>, vector<120x128xbf16>
    %cst = arith.constant dense<0.000000e+00> : vector<50x128xf32>
    %2 = tpu.matmul %0, %1, %cst {dimension_numbers = #tpu.dot_dimension_numbers<[1], [0], [0], [1], [0, 0, 1, 1], [], []>} : vector<50x120xbf16>, vector<120x128xbf16>, vector<50x128xf32> -> vector<50x128xf32>
    %c0_3 = arith.constant 0 : index
    %c0_4 = arith.constant 0 : index
    %3 = vector.load %arg3[%c0_3, %c0_4] : memref<1x128xf32, #tpu.memory_space<vmem>>, vector<1x128xf32>
    %4 = vector.broadcast %3 : vector<1x128xf32> to vector<50x128xf32>
    %5 = arith.mulf %2, %4 : vector<50x128xf32>
    %c0_5 = arith.constant 0 : index
    %c0_6 = arith.constant 0 : index
    %6 = vector.load %arg4[%c0_5, %c0_6] : memref<1x128xf32, #tpu.memory_space<vmem>>, vector<1x128xf32>
    %7 = vector.broadcast %6 : vector<1x128xf32> to vector<50x128xf32>
    %8 = arith.addf %5, %7 : vector<50x128xf32>
    %c0_7 = arith.constant 0 : index
    %c0_8 = arith.constant 0 : index
    %9 = vector.load %arg5[%c0_7, %c0_8] : memref<50x128xf32, #tpu.memory_space<vmem>>, vector<50x128xf32>
    tpu.vector_store %arg5[%c0_7, %c0_8], %8 {strides = array<i32>} : memref<50x128xf32, #tpu.memory_space<vmem>>, vector<50x128xf32>,
    return
  }
  func.func @transform_0(%arg0: i32) -> (i32, i32) {
    %c0_i32 = arith.constant 0 : i32
    %c0_i32_0 = arith.constant 0 : i32
    return %arg0, %c0_i32 : i32, i32
  }
  func.func @transform_1(%arg0: i32) -> (i32, i32) {
    %c0_i32 = arith.constant 0 : i32
    %c0_i32_0 = arith.constant 0 : i32
    %c0_i32_1 = arith.constant 0 : i32
    return %c0_i32, %c0_i32_0 : i32, i32
  }
  func.func @transform_2(%arg0: i32) -> (i32, i32) {
    %c0_i32 = arith.constant 0 : i32
    %c0_i32_0 = arith.constant 0 : i32
    %c0_i32_1 = arith.constant 0 : i32
    return %c0_i32, %c0_i32_0 : i32, i32
  }
  func.func @transform_3(%arg0: i32) -> (i32, i32) {
    %c0_i32 = arith.constant 0 : i32
    %c0_i32_0 = arith.constant 0 : i32
    %c0_i32_1 = arith.constant 0 : i32
    return %c0_i32, %c0_i32_0 : i32, i32
  }
  func.func @transform_4(%arg0: i32) -> (i32, i32) {
    %c0_i32 = arith.constant 0 : i32
    %c0_i32_0 = arith.constant 0 : i32
    return %arg0, %c0_i32 : i32, i32
  }
}

module attributes {stable_mosaic.version = 11 : i64} {
  func.func @_fused_matmul_kernel(%arg0: i32, %arg1: memref<18x1152xbf16, #tpu.memory_space<vmem>>, %arg2: memref<1152x128xbf16, #tpu.memory_space<vmem>>, %arg3: memref<1x128xf32, #tpu.memory_space<vmem>>, %arg4: memref<1x128xf32, #tpu.memory_space<vmem>>, %arg5: memref<18x128xf32, #tpu.memory_space<vmem>>) attributes {dimension_semantics = [#tpu.dimension_semantics<parallel>], iteration_bounds = array<i64: 1>, scalar_prefetch = 0 : i64, scratch_operands = 0 : i64, tpu.core_type = #tpu.core_type<tc>, window_params = [{transform_indices = @transform_0, window_bounds = array<i64: 18, 1152>}, {pipeline_mode = #tpu.pipeline_mode<synchronous>, transform_indices = @transform_1, window_bounds = array<i64: 1152, 128>}, {pipeline_mode = #tpu.pipeline_mode<synchronous>, transform_indices = @transform_2, window_bounds = array<i64: 1, 128>}, {pipeline_mode = #tpu.pipeline_mode<synchronous>, transform_indices = @transform_3, window_bounds = array<i64: 1, 128>}, {transform_indices = @transform_4, window_bounds = array<i64: 18, 128>}]} {
    %c0 = arith.constant 0 : index
    %c0_0 = arith.constant 0 : index
    %0 = vector.load %arg1[%c0, %c0_0] : memref<18x1152xbf16, #tpu.memory_space<vmem>>, vector<18x1152xbf16>
    %c0_1 = arith.constant 0 : index
    %c0_2 = arith.constant 0 : index
    %1 = vector.load %arg2[%c0_1, %c0_2] : memref<1152x128xbf16, #tpu.memory_space<vmem>>, vector<1152x128xbf16>
    %cst = arith.constant dense<0.000000e+00> : vector<18x128xf32>
    %2 = tpu.matmul %0, %1, %cst {dimension_numbers = #tpu.dot_dimension_numbers<[1], [0], [0], [1], [0, 0, 1, 1], [], []>} : vector<18x1152xbf16>, vector<1152x128xbf16>, vector<18x128xf32> -> vector<18x128xf32>
    %c0_3 = arith.constant 0 : index
    %c0_4 = arith.constant 0 : index
    %3 = vector.load %arg3[%c0_3, %c0_4] : memref<1x128xf32, #tpu.memory_space<vmem>>, vector<1x128xf32>
    %4 = vector.broadcast %3 : vector<1x128xf32> to vector<18x128xf32>
    %5 = arith.mulf %2, %4 : vector<18x128xf32>
    %c0_5 = arith.constant 0 : index
    %c0_6 = arith.constant 0 : index
    %6 = vector.load %arg4[%c0_5, %c0_6] : memref<1x128xf32, #tpu.memory_space<vmem>>, vector<1x128xf32>
    %7 = vector.broadcast %6 : vector<1x128xf32> to vector<18x128xf32>
    %8 = arith.addf %5, %7 : vector<18x128xf32>
    %c0_7 = arith.constant 0 : index
    %c0_8 = arith.constant 0 : index
    %9 = vector.load %arg5[%c0_7, %c0_8] : memref<18x128xf32, #tpu.memory_space<vmem>>, vector<18x128xf32>
    tpu.vector_store %arg5[%c0_7, %c0_8], %8 {strides = array<i32>} : memref<18x128xf32, #tpu.memory_space<vmem>>, vector<18x128xf32>,
    return
  }
  func.func @transform_0(%arg0: i32) -> (i32, i32) {
    %c0_i32 = arith.constant 0 : i32
    %c0_i32_0 = arith.constant 0 : i32
    return %arg0, %c0_i32 : i32, i32
  }
  func.func @transform_1(%arg0: i32) -> (i32, i32) {
    %c0_i32 = arith.constant 0 : i32
    %c0_i32_0 = arith.constant 0 : i32
    %c0_i32_1 = arith.constant 0 : i32
    return %c0_i32, %c0_i32_0 : i32, i32
  }
  func.func @transform_2(%arg0: i32) -> (i32, i32) {
    %c0_i32 = arith.constant 0 : i32
    %c0_i32_0 = arith.constant 0 : i32
    %c0_i32_1 = arith.constant 0 : i32
    return %c0_i32, %c0_i32_0 : i32, i32
  }
  func.func @transform_3(%arg0: i32) -> (i32, i32) {
    %c0_i32 = arith.constant 0 : i32
    %c0_i32_0 = arith.constant 0 : i32
    %c0_i32_1 = arith.constant 0 : i32
    return %c0_i32, %c0_i32_0 : i32, i32
  }
  func.func @transform_4(%arg0: i32) -> (i32, i32) {
    %c0_i32 = arith.constant 0 : i32
    %c0_i32_0 = arith.constant 0 : i32
    return %arg0, %c0_i32 : i32, i32
  }
}

module attributes {stable_mosaic.version = 11 : i64} {
  func.func @_fused_matmul_kernel(%arg0: i32, %arg1: memref<18x216xbf16, #tpu.memory_space<vmem>>, %arg2: memref<216x128xbf16, #tpu.memory_space<vmem>>, %arg3: memref<1x128xf32, #tpu.memory_space<vmem>>, %arg4: memref<1x128xf32, #tpu.memory_space<vmem>>, %arg5: memref<18x128xf32, #tpu.memory_space<vmem>>) attributes {dimension_semantics = [#tpu.dimension_semantics<parallel>], iteration_bounds = array<i64: 1>, scalar_prefetch = 0 : i64, scratch_operands = 0 : i64, tpu.core_type = #tpu.core_type<tc>, window_params = [{transform_indices = @transform_0, window_bounds = array<i64: 18, 216>}, {pipeline_mode = #tpu.pipeline_mode<synchronous>, transform_indices = @transform_1, window_bounds = array<i64: 216, 128>}, {pipeline_mode = #tpu.pipeline_mode<synchronous>, transform_indices = @transform_2, window_bounds = array<i64: 1, 128>}, {pipeline_mode = #tpu.pipeline_mode<synchronous>, transform_indices = @transform_3, window_bounds = array<i64: 1, 128>}, {transform_indices = @transform_4, window_bounds = array<i64: 18, 128>}]} {
    %c0 = arith.constant 0 : index
    %c0_0 = arith.constant 0 : index
    %0 = vector.load %arg1[%c0, %c0_0] : memref<18x216xbf16, #tpu.memory_space<vmem>>, vector<18x216xbf16>
    %c0_1 = arith.constant 0 : index
    %c0_2 = arith.constant 0 : index
    %1 = vector.load %arg2[%c0_1, %c0_2] : memref<216x128xbf16, #tpu.memory_space<vmem>>, vector<216x128xbf16>
    %cst = arith.constant dense<0.000000e+00> : vector<18x128xf32>
    %2 = tpu.matmul %0, %1, %cst {dimension_numbers = #tpu.dot_dimension_numbers<[1], [0], [0], [1], [0, 0, 1, 1], [], []>} : vector<18x216xbf16>, vector<216x128xbf16>, vector<18x128xf32> -> vector<18x128xf32>
    %c0_3 = arith.constant 0 : index
    %c0_4 = arith.constant 0 : index
    %3 = vector.load %arg3[%c0_3, %c0_4] : memref<1x128xf32, #tpu.memory_space<vmem>>, vector<1x128xf32>
    %4 = vector.broadcast %3 : vector<1x128xf32> to vector<18x128xf32>
    %5 = arith.mulf %2, %4 : vector<18x128xf32>
    %c0_5 = arith.constant 0 : index
    %c0_6 = arith.constant 0 : index
    %6 = vector.load %arg4[%c0_5, %c0_6] : memref<1x128xf32, #tpu.memory_space<vmem>>, vector<1x128xf32>
    %7 = vector.broadcast %6 : vector<1x128xf32> to vector<18x128xf32>
    %8 = arith.addf %5, %7 : vector<18x128xf32>
    %cst_7 = arith.constant 0.000000e+00 : f32
    %9 = vector.broadcast %cst_7 : f32 to vector<18x128xf32>
    %10 = arith.maximumf %8, %9 : vector<18x128xf32>
    %c0_8 = arith.constant 0 : index
    %c0_9 = arith.constant 0 : index
    %11 = vector.load %arg5[%c0_8, %c0_9] : memref<18x128xf32, #tpu.memory_space<vmem>>, vector<18x128xf32>
    tpu.vector_store %arg5[%c0_8, %c0_9], %10 {strides = array<i32>} : memref<18x128xf32, #tpu.memory_space<vmem>>, vector<18x128xf32>,
    return
  }
  func.func @transform_0(%arg0: i32) -> (i32, i32) {
    %c0_i32 = arith.constant 0 : i32
    %c0_i32_0 = arith.constant 0 : i32
    return %arg0, %c0_i32 : i32, i32
  }
  func.func @transform_1(%arg0: i32) -> (i32, i32) {
    %c0_i32 = arith.constant 0 : i32
    %c0_i32_0 = arith.constant 0 : i32
    %c0_i32_1 = arith.constant 0 : i32
    return %c0_i32, %c0_i32_0 : i32, i32
  }
  func.func @transform_2(%arg0: i32) -> (i32, i32) {
    %c0_i32 = arith.constant 0 : i32
    %c0_i32_0 = arith.constant 0 : i32
    %c0_i32_1 = arith.constant 0 : i32
    return %c0_i32, %c0_i32_0 : i32, i32
  }
  func.func @transform_3(%arg0: i32) -> (i32, i32) {
    %c0_i32 = arith.constant 0 : i32
    %c0_i32_0 = arith.constant 0 : i32
    %c0_i32_1 = arith.constant 0 : i32
    return %c0_i32, %c0_i32_0 : i32, i32
  }
  func.func @transform_4(%arg0: i32) -> (i32, i32) {
    %c0_i32 = arith.constant 0 : i32
    %c0_i32_0 = arith.constant 0 : i32
    return %arg0, %c0_i32 : i32, i32
  }
}

module attributes {stable_mosaic.version = 11 : i64} {
  func.func @_fused_matmul_kernel(%arg0: i32, %arg1: memref<18x216xbf16, #tpu.memory_space<vmem>>, %arg2: memref<216x128xbf16, #tpu.memory_space<vmem>>, %arg3: memref<1x128xf32, #tpu.memory_space<vmem>>, %arg4: memref<1x128xf32, #tpu.memory_space<vmem>>, %arg5: memref<18x128xf32, #tpu.memory_space<vmem>>, %arg6: memref<18x128xf32, #tpu.memory_space<vmem>>) attributes {dimension_semantics = [#tpu.dimension_semantics<parallel>], iteration_bounds = array<i64: 1>, scalar_prefetch = 0 : i64, scratch_operands = 0 : i64, tpu.core_type = #tpu.core_type<tc>, window_params = [{transform_indices = @transform_0, window_bounds = array<i64: 18, 216>}, {pipeline_mode = #tpu.pipeline_mode<synchronous>, transform_indices = @transform_1, window_bounds = array<i64: 216, 128>}, {pipeline_mode = #tpu.pipeline_mode<synchronous>, transform_indices = @transform_2, window_bounds = array<i64: 1, 128>}, {pipeline_mode = #tpu.pipeline_mode<synchronous>, transform_indices = @transform_3, window_bounds = array<i64: 1, 128>}, {transform_indices = @transform_4, window_bounds = array<i64: 18, 128>}, {transform_indices = @transform_5, window_bounds = array<i64: 18, 128>}]} {
    %c0 = arith.constant 0 : index
    %c0_0 = arith.constant 0 : index
    %0 = vector.load %arg1[%c0, %c0_0] : memref<18x216xbf16, #tpu.memory_space<vmem>>, vector<18x216xbf16>
    %c0_1 = arith.constant 0 : index
    %c0_2 = arith.constant 0 : index
    %1 = vector.load %arg2[%c0_1, %c0_2] : memref<216x128xbf16, #tpu.memory_space<vmem>>, vector<216x128xbf16>
    %cst = arith.constant dense<0.000000e+00> : vector<18x128xf32>
    %2 = tpu.matmul %0, %1, %cst {dimension_numbers = #tpu.dot_dimension_numbers<[1], [0], [0], [1], [0, 0, 1, 1], [], []>} : vector<18x216xbf16>, vector<216x128xbf16>, vector<18x128xf32> -> vector<18x128xf32>
    %c0_3 = arith.constant 0 : index
    %c0_4 = arith.constant 0 : index
    %3 = vector.load %arg3[%c0_3, %c0_4] : memref<1x128xf32, #tpu.memory_space<vmem>>, vector<1x128xf32>
    %4 = vector.broadcast %3 : vector<1x128xf32> to vector<18x128xf32>
    %5 = arith.mulf %2, %4 : vector<18x128xf32>
    %c0_5 = arith.constant 0 : index
    %c0_6 = arith.constant 0 : index
    %6 = vector.load %arg4[%c0_5, %c0_6] : memref<1x128xf32, #tpu.memory_space<vmem>>, vector<1x128xf32>
    %7 = vector.broadcast %6 : vector<1x128xf32> to vector<18x128xf32>
    %8 = arith.addf %5, %7 : vector<18x128xf32>
    %cst_7 = arith.constant 0.000000e+00 : f32
    %9 = vector.broadcast %cst_7 : f32 to vector<18x128xf32>
    %10 = arith.maximumf %8, %9 : vector<18x128xf32>
    %c0_8 = arith.constant 0 : index
    %c0_9 = arith.constant 0 : index
    %11 = vector.load %arg5[%c0_8, %c0_9] : memref<18x128xf32, #tpu.memory_space<vmem>>, vector<18x128xf32>
    %12 = arith.addf %10, %11 : vector<18x128xf32>
    %c0_10 = arith.constant 0 : index
    %c0_11 = arith.constant 0 : index
    %13 = vector.load %arg6[%c0_10, %c0_11] : memref<18x128xf32, #tpu.memory_space<vmem>>, vector<18x128xf32>
    tpu.vector_store %arg6[%c0_10, %c0_11], %12 {strides = array<i32>} : memref<18x128xf32, #tpu.memory_space<vmem>>, vector<18x128xf32>,
    return
  }
  func.func @transform_0(%arg0: i32) -> (i32, i32) {
    %c0_i32 = arith.constant 0 : i32
    %c0_i32_0 = arith.constant 0 : i32
    return %arg0, %c0_i32 : i32, i32
  }
  func.func @transform_1(%arg0: i32) -> (i32, i32) {
    %c0_i32 = arith.constant 0 : i32
    %c0_i32_0 = arith.constant 0 : i32
    %c0_i32_1 = arith.constant 0 : i32
    return %c0_i32, %c0_i32_0 : i32, i32
  }
  func.func @transform_2(%arg0: i32) -> (i32, i32) {
    %c0_i32 = arith.constant 0 : i32
    %c0_i32_0 = arith.constant 0 : i32
    %c0_i32_1 = arith.constant 0 : i32
    return %c0_i32, %c0_i32_0 : i32, i32
  }
  func.func @transform_3(%arg0: i32) -> (i32, i32) {
    %c0_i32 = arith.constant 0 : i32
    %c0_i32_0 = arith.constant 0 : i32
    %c0_i32_1 = arith.constant 0 : i32
    return %c0_i32, %c0_i32_0 : i32, i32
  }
  func.func @transform_4(%arg0: i32) -> (i32, i32) {
    %c0_i32 = arith.constant 0 : i32
    %c0_i32_0 = arith.constant 0 : i32
    return %arg0, %c0_i32 : i32, i32
  }
  func.func @transform_5(%arg0: i32) -> (i32, i32) {
    %c0_i32 = arith.constant 0 : i32
    %c0_i32_0 = arith.constant 0 : i32
    return %arg0, %c0_i32 : i32, i32
  }
}

module attributes {stable_mosaic.version = 11 : i64} {
  func.func @_fused_matmul_kernel(%arg0: i32, %arg1: memref<2x216xbf16, #tpu.memory_space<vmem>>, %arg2: memref<216x128xbf16, #tpu.memory_space<vmem>>, %arg3: memref<1x128xf32, #tpu.memory_space<vmem>>, %arg4: memref<2x128xf32, #tpu.memory_space<vmem>>) attributes {dimension_semantics = [#tpu.dimension_semantics<parallel>], iteration_bounds = array<i64: 1>, scalar_prefetch = 0 : i64, scratch_operands = 0 : i64, tpu.core_type = #tpu.core_type<tc>, window_params = [{transform_indices = @transform_0, window_bounds = array<i64: 2, 216>}, {pipeline_mode = #tpu.pipeline_mode<synchronous>, transform_indices = @transform_1, window_bounds = array<i64: 216, 128>}, {pipeline_mode = #tpu.pipeline_mode<synchronous>, transform_indices = @transform_2, window_bounds = array<i64: 1, 128>}, {transform_indices = @transform_3, window_bounds = array<i64: 2, 128>}]} {
    %c0 = arith.constant 0 : index
    %c0_0 = arith.constant 0 : index
    %0 = vector.load %arg1[%c0, %c0_0] : memref<2x216xbf16, #tpu.memory_space<vmem>>, vector<2x216xbf16>
    %c0_1 = arith.constant 0 : index
    %c0_2 = arith.constant 0 : index
    %1 = vector.load %arg2[%c0_1, %c0_2] : memref<216x128xbf16, #tpu.memory_space<vmem>>, vector<216x128xbf16>
    %cst = arith.constant dense<0.000000e+00> : vector<2x128xf32>
    %2 = tpu.matmul %0, %1, %cst {dimension_numbers = #tpu.dot_dimension_numbers<[1], [0], [0], [1], [0, 0, 1, 1], [], []>} : vector<2x216xbf16>, vector<216x128xbf16>, vector<2x128xf32> -> vector<2x128xf32>
    %c0_3 = arith.constant 0 : index
    %c0_4 = arith.constant 0 : index
    %3 = vector.load %arg3[%c0_3, %c0_4] : memref<1x128xf32, #tpu.memory_space<vmem>>, vector<1x128xf32>
    %4 = vector.broadcast %3 : vector<1x128xf32> to vector<2x128xf32>
    %5 = arith.addf %2, %4 : vector<2x128xf32>
    %c0_5 = arith.constant 0 : index
    %c0_6 = arith.constant 0 : index
    %6 = vector.load %arg4[%c0_5, %c0_6] : memref<2x128xf32, #tpu.memory_space<vmem>>, vector<2x128xf32>
    tpu.vector_store %arg4[%c0_5, %c0_6], %5 {strides = array<i32>} : memref<2x128xf32, #tpu.memory_space<vmem>>, vector<2x128xf32>,
    return
  }
  func.func @transform_0(%arg0: i32) -> (i32, i32) {
    %c0_i32 = arith.constant 0 : i32
    %c0_i32_0 = arith.constant 0 : i32
    return %arg0, %c0_i32 : i32, i32
  }
  func.func @transform_1(%arg0: i32) -> (i32, i32) {
    %c0_i32 = arith.constant 0 : i32
    %c0_i32_0 = arith.constant 0 : i32
    %c0_i32_1 = arith.constant 0 : i32
    return %c0_i32, %c0_i32_0 : i32, i32
  }
  func.func @transform_2(%arg0: i32) -> (i32, i32) {
    %c0_i32 = arith.constant 0 : i32
    %c0_i32_0 = arith.constant 0 : i32
    %c0_i32_1 = arith.constant 0 : i32
    return %c0_i32, %c0_i32_0 : i32, i32
  }
  func.func @transform_3(%arg0: i32) -> (i32, i32) {
    %c0_i32 = arith.constant 0 : i32
    %c0_i32_0 = arith.constant 0 : i32
    return %arg0, %c0_i32 : i32, i32
  }
}

</mosaic_0001>

<bundles_post_ra>
// kernel: ssrn_forward.10
= control target key start
LH: loop header
LB: loop body
LE: loop exit
PB: predicated region body
PF: predicated region fallthrough
CT: control target
= control target key end

     0   :  { %vm180_vm0 = vcmask 1042432   ;;  %vm181_vm1 = vcmask 1043456   ;;  %vm131_vm2 = vcmask 56320   ;;  %v566_v1 = vmov 65535   ;;  %s829_s1 = inlined_call_operand.vmem [shape: bf16[7,128], index: 1, kind: input, shape index: {}]   ;;  %s830_s0 = inlined_call_operand.vmem [shape: bf16[250,7], index: 0, kind: input, shape index: {}]   ;;  %s831_s2 = inlined_call_operand.vmem [shape: f32[1,128], index: 2, kind: input, shape index: {}]   ;;  %s832_s3 = inlined_call_operand.vmem [shape: f32[1,128], index: 3, kind: input, shape index: {}]   ;;  %s833_s4 = inlined_call_operand.vmem [shape: f32[250,128], index: 4, kind: output, shape index: {}]  }
   0x1   :  { %v50_v0 = vld [vmem:[%s829_s1] sm:$0xf]  ;;  %v182_v2 = vsel %vm180_vm0, 4294967295, %v566_v1  ;;  %v552_v7 = vld [vmem:[%s830_s0 + $0x8] sm:$0xff]   ;;  %v554_v9 = vld [vmem:[%s830_s0 + $0x10] sm:$0xff]  }
   0x2   :  { %v550_v3 = vld [vmem:[%s830_s0] sm:$0xff]   ;;  %v183_v4 = vsel %vm181_vm1, %v182_v2, 0  ;;  %v553_v8 = vld [vmem:[%s830_s0 + $0x48] sm:$0xff]   ;;  %v555_v10 = vld [vmem:[%s830_s0 + $0x50] sm:$0xff]  }
   0x3   :  { %v551_v5 = vld [vmem:[%s830_s0 + $0x40] sm:$0xff]   ;;  %v185_v6 = vand.u32 %v183_v4, %v50_v0  ;;  %515 = vmatprep.mubr.msk.bf16.mxu0 %vm131_vm2, %v550_v3  ;;  %v556_v11 = vld [vmem:[%s830_s0 + $0x18] sm:$0xff]   ;;  %v560_v15 = vld [vmem:[%s830_s0 + $0x28] sm:$0xff]  }
   0x4   :  { %531 = vmatprep.mubr.msk.bf16.mxu1 %vm131_vm2, %v551_v5  ;;  %v557_v12 = vld [vmem:[%s830_s0 + $0x58] sm:$0xff]   ;;  %v558_v13 = vld [vmem:[%s830_s0 + $0x20] sm:$0xff]   ;;  %v561_v16 = vld [vmem:[%s830_s0 + $0x68] sm:$0xff]  }
   0x5   :  { %513 = vmatprep.subr.bf16.mxu0 %v185_v6  ;;  %547 = vmatprep.subr.bf16.mxu1 %v185_v6  ;;  %v559_v14 = vld [vmem:[%s830_s0 + $0x60] sm:$0xff]   ;;  %v562_v17 = vld [vmem:[%s830_s0 + $0x30] sm:$0xff]   ;;  %v564_v19 = vld [vmem:[%s830_s0 + $0x38] sm:$0xff]  }
   0x6   :  { %514 = vmatpush3.bf16.msra.mxu0 %v185_v6  ;;  %548 = vmatpush3.bf16.msra.mxu1 %v185_v6  ;;  %v563_v18 = vld [vmem:[%s830_s0 + $0x70] sm:$0xff]   ;;  %v565_v20 = vld [vmem:[%s830_s0 + $0x78] sm:$0x1f]   ;;  %v662_v21 = vld [vmem:[%s831_s2] ss:$0 sm:$0xff] }
   0x7   :  { %v667_v23 = vld [vmem:[%s832_s3] ss:$0 sm:$0xff] }
   0x9   :  { %516 = vmatmul.mubr.msk.bf16.vlgmr.msra.gmra.mrb[0].mxu0 %vm131_vm2, %v552_v7  ;;  %532 = vmatmul.mubr.msk.bf16.vlgmr.msra.gmra.mrb[0].mxu1 %vm131_vm2, %v553_v8 }
   0xa   :  { %519 = vmatprep.mubr.msk.bf16.mxu0 %vm131_vm2, %v554_v9  ;;  %535 = vmatprep.mubr.msk.bf16.mxu1 %vm131_vm2, %v555_v10 }
  0x11   :  { %520 = vmatmul.mubr.msk.bf16.gmra.mrb[4].mxu0 %vm131_vm2, %v556_v11  ;;  %536 = vmatmul.mubr.msk.bf16.gmra.mrb[4].mxu1 %vm131_vm2, %v557_v12 }
  0x12   :  { %523 = vmatprep.mubr.msk.bf16.mxu0 %vm131_vm2, %v558_v13  ;;  %539 = vmatprep.mubr.msk.bf16.mxu1 %vm131_vm2, %v559_v14 }
  0x19   :  { %524 = vmatmul.mubr.msk.bf16.gmra.mrb[8].mxu0 %vm131_vm2, %v560_v15  ;;  %540 = vmatmul.mubr.msk.bf16.gmra.mrb[8].mxu1 %vm131_vm2, %v561_v16 }
  0x1a   :  { %527 = vmatprep.mubr.msk.bf16.mxu0 %vm131_vm2, %v562_v17  ;;  %543 = vmatprep.mubr.msk.bf16.mxu1 %vm131_vm2, %v563_v18 }
  0x21   :  { %528 = vmatmul.mubr.msk.bf16.gmra.mrb[12].mxu0 %vm131_vm2, %v564_v19  ;;  %544 = vmatmul.mubr.msk.bf16.gmra.mrb[12].mxu1 %vm131_vm2, %v565_v20 }
  0xdc   :  { %v517_v22 = vpop.f32.mrb[0].mxu0  ;;  %v533_v24 = vpop.f32.mrb[0].mxu1 }
  0xdd   :  { %v357_v25 = vmul.f32 %v517_v22, %v662_v21  ;;  %v373_v26 = vmul.f32 %v533_v24, %v662_v21  ;;  %v221_v27 = vpop.f32.mrb[1].mxu0  ;;  %v285_v28 = vpop.f32.mrb[1].mxu1 }
  0xde   :  { %v355_v29 = vmul.f32 %v662_v21, %v221_v27  ;;  %v371_v30 = vmul.f32 %v662_v21, %v285_v28  ;;  %v518_v31 = vpop.f32.mrb[2].mxu0  ;;  %v534_v32 = vpop.f32.mrb[2].mxu1 }
  0xdf   :  { %v396_v33 = vadd.f32 %v667_v23, %v357_v25  ;;  %v412_v34 = vadd.f32 %v667_v23, %v373_v26  ;;  %v358_v35 = vmul.f32 %v518_v31, %v662_v21  ;;  %v374_v36 = vmul.f32 %v534_v32, %v662_v21  ;;  %v224_v37 = vpop.f32.mrb[3].mxu0  ;;  %v288_v38 = vpop.f32.mrb[3].mxu1 }
  0xe0   :  { %v394_v39 = vadd.f32 %v667_v23, %v355_v29  ;;  %v410_v40 = vadd.f32 %v667_v23, %v371_v30  ;;  %v356_v41 = vmul.f32 %v662_v21, %v224_v37  ;;  %v372_v42 = vmul.f32 %v662_v21, %v288_v38 }
  0xe1   :  { %428 = vst [vmem:[%s833_s4 + $0x10] sm:$0xff] %v396_v33  ;;  %444 = vst [vmem:[%s833_s4 + $0x90] sm:$0xff] %v412_v34  ;;  %v397_v43 = vadd.f32 %v667_v23, %v358_v35  ;;  %v413_v44 = vadd.f32 %v667_v23, %v374_v36 }
  0xe2   :  { %426 = vst [vmem:[%s833_s4] sm:$0xff] %v394_v39  ;;  %442 = vst [vmem:[%s833_s4 + $0x80] sm:$0xff] %v410_v40  ;;  %v395_v45 = vadd.f32 %v667_v23, %v356_v41  ;;  %v411_v46 = vadd.f32 %v667_v23, %v372_v42 }
  0xe3   :  { %429 = vst [vmem:[%s833_s4 + $0x18] sm:$0xff] %v397_v43  ;;  %445 = vst [vmem:[%s833_s4 + $0x98] sm:$0xff] %v413_v44 }
  0xe4   :  { %427 = vst [vmem:[%s833_s4 + $0x8] sm:$0xff] %v395_v45  ;;  %443 = vst [vmem:[%s833_s4 + $0x88] sm:$0xff] %v411_v46  ;;  %v521_v47 = vpop.f32.mrb[4].mxu0  ;;  %v537_v48 = vpop.f32.mrb[4].mxu1 }
  0xe5   :  { %v361_v49 = vmul.f32 %v521_v47, %v662_v21  ;;  %v377_v50 = vmul.f32 %v537_v48, %v662_v21  ;;  %v237_v51 = vpop.f32.mrb[5].mxu0  ;;  %v301_v52 = vpop.f32.mrb[5].mxu1 }
  0xe6   :  { %v359_v53 = vmul.f32 %v662_v21, %v237_v51  ;;  %v375_v54 = vmul.f32 %v662_v21, %v301_v52  ;;  %v522_v55 = vpop.f32.mrb[6].mxu0  ;;  %v538_v56 = vpop.f32.mrb[6].mxu1 }
  0xe7   :  { %v400_v57 = vadd.f32 %v667_v23, %v361_v49  ;;  %v416_v58 = vadd.f32 %v667_v23, %v377_v50  ;;  %v362_v59 = vmul.f32 %v522_v55, %v662_v21  ;;  %v378_v60 = vmul.f32 %v538_v56, %v662_v21  ;;  %v240_v61 = vpop.f32.mrb[7].mxu0  ;;  %v304_v62 = vpop.f32.mrb[7].mxu1 }
  0xe8   :  { %v398_v63 = vadd.f32 %v667_v23, %v359_v53  ;;  %v414_v0 = vadd.f32 %v667_v23, %v375_v54  ;;  %v360_v1 = vmul.f32 %v662_v21, %v240_v61  ;;  %v376_v2 = vmul.f32 %v662_v21, %v304_v62 }
  0xe9   :  { %432 = vst [vmem:[%s833_s4 + $0x30] sm:$0xff] %v400_v57  ;;  %448 = vst [vmem:[%s833_s4 + $0xb0] sm:$0xff] %v416_v58  ;;  %v401_v3 = vadd.f32 %v667_v23, %v362_v59  ;;  %v417_v4 = vadd.f32 %v667_v23, %v378_v60 }
  0xea   :  { %430 = vst [vmem:[%s833_s4 + $0x20] sm:$0xff] %v398_v63  ;;  %446 = vst [vmem:[%s833_s4 + $0xa0] sm:$0xff] %v414_v0  ;;  %v399_v5 = vadd.f32 %v667_v23, %v360_v1  ;;  %v415_v6 = vadd.f32 %v667_v23, %v376_v2 }
  0xeb   :  { %433 = vst [vmem:[%s833_s4 + $0x38] sm:$0xff] %v401_v3  ;;  %449 = vst [vmem:[%s833_s4 + $0xb8] sm:$0xff] %v417_v4 }
  0xec   :  { %431 = vst [vmem:[%s833_s4 + $0x28] sm:$0xff] %v399_v5  ;;  %447 = vst [vmem:[%s833_s4 + $0xa8] sm:$0xff] %v415_v6  ;;  %v525_v7 = vpop.f32.mrb[8].mxu0  ;;  %v541_v8 = vpop.f32.mrb[8].mxu1 }
  0xed   :  { %v365_v9 = vmul.f32 %v525_v7, %v662_v21  ;;  %v381_v10 = vmul.f32 %v541_v8, %v662_v21  ;;  %v253_v11 = vpop.f32.mrb[9].mxu0  ;;  %v317_v12 = vpop.f32.mrb[9].mxu1 }
  0xee   :  { %v363_v13 = vmul.f32 %v662_v21, %v253_v11  ;;  %v379_v14 = vmul.f32 %v662_v21, %v317_v12  ;;  %v526_v15 = vpop.f32.mrb[10].mxu0  ;;  %v542_v16 = vpop.f32.mrb[10].mxu1 }
  0xef   :  { %v404_v17 = vadd.f32 %v667_v23, %v365_v9  ;;  %v420_v18 = vadd.f32 %v667_v23, %v381_v10  ;;  %v366_v19 = vmul.f32 %v526_v15, %v662_v21  ;;  %v382_v20 = vmul.f32 %v542_v16, %v662_v21  ;;  %v256_v22 = vpop.f32.mrb[11].mxu0  ;;  %v320_v24 = vpop.f32.mrb[11].mxu1 }
  0xf0   :  { %v402_v25 = vadd.f32 %v667_v23, %v363_v13  ;;  %v418_v26 = vadd.f32 %v667_v23, %v379_v14  ;;  %v364_v27 = vmul.f32 %v662_v21, %v256_v22  ;;  %v380_v28 = vmul.f32 %v662_v21, %v320_v24 }
  0xf1   :  { %436 = vst [vmem:[%s833_s4 + $0x50] sm:$0xff] %v404_v17  ;;  %452 = vst [vmem:[%s833_s4 + $0xd0] sm:$0xff] %v420_v18  ;;  %v405_v29 = vadd.f32 %v667_v23, %v366_v19  ;;  %v421_v30 = vadd.f32 %v667_v23, %v382_v20 }
  0xf2   :  { %434 = vst [vmem:[%s833_s4 + $0x40] sm:$0xff] %v402_v25  ;;  %450 = vst [vmem:[%s833_s4 + $0xc0] sm:$0xff] %v418_v26  ;;  %v403_v31 = vadd.f32 %v667_v23, %v364_v27  ;;  %v419_v32 = vadd.f32 %v667_v23, %v380_v28 }
  0xf3   :  { %437 = vst [vmem:[%s833_s4 + $0x58] sm:$0xff] %v405_v29  ;;  %453 = vst [vmem:[%s833_s4 + $0xd8] sm:$0xff] %v421_v30 }
  0xf4   :  { %435 = vst [vmem:[%s833_s4 + $0x48] sm:$0xff] %v403_v31  ;;  %451 = vst [vmem:[%s833_s4 + $0xc8] sm:$0xff] %v419_v32  ;;  %v529_v33 = vpop.f32.mrb[12].mxu0  ;;  %v545_v34 = vpop.f32.mrb[12].mxu1 }
  0xf5   :  { %v369_v35 = vmul.f32 %v529_v33, %v662_v21  ;;  %v385_v36 = vmul.f32 %v545_v34, %v662_v21  ;;  %v269_v37 = vpop.f32.mrb[13].mxu0  ;;  %v333_v38 = vpop.f32.mrb[13].mxu1 }
  0xf6   :  { %v367_v39 = vmul.f32 %v662_v21, %v269_v37  ;;  %v383_v40 = vmul.f32 %v662_v21, %v333_v38  ;;  %v530_v41 = vpop.f32.mrb[14].mxu0  ;;  %v546_v42 = vpop.f32.mrb[14].mxu1 }
  0xf7   :  { %v408_v43 = vadd.f32 %v667_v23, %v369_v35  ;;  %v424_v44 = vadd.f32 %v667_v23, %v385_v36  ;;  %v370_v45 = vmul.f32 %v530_v41, %v662_v21  ;;  %v386_v46 = vmul.f32 %v546_v42, %v662_v21  ;;  %v272_v47 = vpop.f32.mrb[15].mxu0  ;;  %v336_v48 = vpop.f32.mrb[15].mxu1 }
  0xf8   :  { %v406_v49 = vadd.f32 %v667_v23, %v367_v39  ;;  %v422_v50 = vadd.f32 %v667_v23, %v383_v40  ;;  %v368_v51 = vmul.f32 %v662_v21, %v272_v47  ;;  %v384_v52 = vmul.f32 %v662_v21, %v336_v48 }
  0xf9   :  { %440 = vst [vmem:[%s833_s4 + $0x70] sm:$0xff] %v408_v43  ;;  %456 = vst [vmem:[%s833_s4 + $0xf0] sm:$0xff] %v424_v44  ;;  %v409_v53 = vadd.f32 %v667_v23, %v370_v45  ;;  %v425_v54 = vadd.f32 %v667_v23, %v386_v46 }
  0xfa   :  { %438 = vst [vmem:[%s833_s4 + $0x60] sm:$0xff] %v406_v49  ;;  %454 = vst [vmem:[%s833_s4 + $0xe0] sm:$0xff] %v422_v50  ;;  %v407_v21 = vadd.f32 %v667_v23, %v368_v51  ;;  %v423_v55 = vadd.f32 %v667_v23, %v384_v52 }
  0xfb   :  { %441 = vst [vmem:[%s833_s4 + $0x78] sm:$0xff] %v409_v53  ;;  %457 = vst [vmem:[%s833_s4 + $0xf8] sm:$0x3] %v425_v54 }
  0xfc   :  { %439 = vst [vmem:[%s833_s4 + $0x68] sm:$0xff] %v407_v21  ;;  %455 = vst [vmem:[%s833_s4 + $0xe8] sm:$0xff] %v423_v55 }

// kernel: ssrn_forward.12
= control target key start
LH: loop header
LB: loop body
LE: loop exit
PB: predicated region body
PF: predicated region fallthrough
CT: control target
= control target key end

     0   :  { %v848_v0 = vmov 0   ;;  %vm281_vm0 = vcmask 326656   ;;  %vm330_vm1 = vcmask 1043456   ;;  %s1290_s1 = inlined_call_operand.vmem [shape: bf16[168,128], index: 1, kind: input, shape index: {}]   ;;  %s1291_s0 = inlined_call_operand.vmem [shape: bf16[250,168], index: 0, kind: input, shape index: {}]   ;;  %s1292_s2 = inlined_call_operand.vmem [shape: f32[1,128], index: 2, kind: input, shape index: {}]   ;;  %s1293_s3 = inlined_call_operand.vmem [shape: f32[1,128], index: 3, kind: input, shape index: {}]   ;;  %s1294_s4 = inlined_call_operand.vmem [shape: f32[250,128], index: 4, kind: input, shape index: {}]   ;;  %s1295_s5 = inlined_call_operand.vmem [shape: f32[250,128], index: 5, kind: output, shape index: {}]  }
   0x1   :  { %334 = vmatprep.subr.bf16.mxu0 %v848_v0  ;;  %766 = vmatprep.subr.bf16.mxu1 %v848_v0  ;;  %v789_v1 = vld [vmem:[%s1290_s1] sm:$0xff]   ;;  %v790_v2 = vld [vmem:[%s1290_s1 + $0x8] sm:$0xff]   ;;  %v791_v3 = vld [vmem:[%s1290_s1 + $0x10] sm:$0xff]  }
   0x2   :  { %335 = vmatpush1.bf16.msra.mxu0 %v789_v1  ;;  %777 = vmatpush1.bf16.msra.mxu1 %v789_v1  ;;  %v792_v4 = vld [vmem:[%s1290_s1 + $0x18] sm:$0xff]   ;;  %v802_v5 = vld [vmem:[%s1291_s0 + $0x4] ss:$8 sps:$4 sm:$0xff]   ;;  %v795_v9 = vld [vmem:[%s1290_s1 + $0x30] sm:$0xff]  }
   0x3   :  { %336 = vmatprep.subr.bf16.mxu0 %v848_v0  ;;  %767 = vmatprep.subr.bf16.mxu1 %v848_v0  ;;  %v805_v6 = vld [vmem:[%s1291_s0 + $0x84] ss:$8 sps:$4 sm:$0xff]   ;;  %v796_v10 = vld [vmem:[%s1290_s1 + $0x38] sm:$0xff]   ;;  %v799_v13 = vld [vmem:[%s1290_s1 + $0x50] ss:$0 sps:$4 sm:$0xff]  }
   0x4   :  { %748 = vmatprep.mubr.msk.bf16.mxu0 %vm281_vm0, %v802_v5  ;;  %v793_v7 = vld [vmem:[%s1290_s1 + $0x20] sm:$0xff]   ;;  %756 = vmatprep.mubr.msk.bf16.mxu1 %vm281_vm0, %v805_v6  ;;  %v794_v8 = vld [vmem:[%s1290_s1 + $0x28] sm:$0xff]   ;;  %v332_v14 = vsel %vm330_vm1, %v799_v13, 0  ;;  %v806_v17 = vld [vmem:[%s1291_s0 + $0x14] ss:$8 sps:$4 sm:$0xff]  }
   0x5   :  { %v797_v11 = vld [vmem:[%s1290_s1 + $0x40] sm:$0xff]   ;;  %v798_v12 = vld [vmem:[%s1290_s1 + $0x48] sm:$0xff]   ;;  %v808_v18 = vld [vmem:[%s1291_s0 + $0x94] ss:$8 sps:$4 sm:$0xff]  }
   0x6   :  { %337 = vmatpush1.bf16.msra.mxu0 %v790_v2  ;;  %778 = vmatpush1.bf16.msra.mxu1 %v790_v2  ;;  %v800_v15 = vld [vmem:[%s1291_s0] ss:$8 sps:$4 sm:$0xff]   ;;  %v810_v19 = vld [vmem:[%s1291_s0 + $0x10] ss:$8 sps:$4 sm:$0xff]   ;;  %v812_v21 = vld [vmem:[%s1291_s0 + $0x24] ss:$8 sps:$4 sm:$0xff]  }
   0x7   :  { %338 = vmatprep.subr.bf16.mxu0 %v848_v0  ;;  %768 = vmatprep.subr.bf16.mxu1 %v848_v0  ;;  %v803_v16 = vld [vmem:[%s1291_s0 + $0x80] ss:$8 sps:$4 sm:$0xff]   ;;  %v811_v20 = vld [vmem:[%s1291_s0 + $0x90] ss:$8 sps:$4 sm:$0xff]   ;;  %v814_v22 = vld [vmem:[%s1291_s0 + $0xa4] ss:$8 sps:$4 sm:$0xff]  }
   0x8   :  { %v816_v23 = vld [vmem:[%s1291_s0 + $0x20] ss:$8 sps:$4 sm:$0xff]   ;;  %v818_v25 = vld [vmem:[%s1291_s0 + $0x34] ss:$8 sps:$4 sm:$0xff]   ;;  %v822_v27 = vld [vmem:[%s1291_s0 + $0x30] ss:$8 sps:$4 sm:$0xff]  }
   0x9   :  { %v817_v24 = vld [vmem:[%s1291_s0 + $0xa0] ss:$8 sps:$4 sm:$0xff]   ;;  %v820_v26 = vld [vmem:[%s1291_s0 + $0xb4] ss:$8 sps:$4 sm:$0xff]   ;;  %v823_v28 = vld [vmem:[%s1291_s0 + $0xb0] ss:$8 sps:$4 sm:$0xff]  }
   0xa   :  { %339 = vmatpush1.bf16.msra.mxu0 %v791_v3  ;;  %779 = vmatpush1.bf16.msra.mxu1 %v791_v3  ;;  %v824_v29 = vld [vmem:[%s1291_s0 + $0x44] ss:$8 sps:$4 sm:$0xff]   ;;  %v828_v31 = vld [vmem:[%s1291_s0 + $0x40] ss:$8 sps:$4 sm:$0xff]   ;;  %v830_v33 = vld [vmem:[%s1291_s0 + $0x54] ss:$8 sps:$4 sm:$0xff]  }
   0xb   :  { %340 = vmatprep.subr.bf16.mxu0 %v848_v0  ;;  %769 = vmatprep.subr.bf16.mxu1 %v848_v0  ;;  %v826_v30 = vld [vmem:[%s1291_s0 + $0xc4] ss:$8 sps:$4 sm:$0xff]   ;;  %v829_v32 = vld [vmem:[%s1291_s0 + $0xc0] ss:$8 sps:$4 sm:$0xff]   ;;  %v832_v34 = vld [vmem:[%s1291_s0 + $0xd4] ss:$8 sps:$4 sm:$0xff]  }
   0xc   :  { %v834_v35 = vld [vmem:[%s1291_s0 + $0x50] ss:$8 sps:$4 sm:$0xff]   ;;  %v836_v37 = vld [vmem:[%s1291_s0 + $0x64] ss:$8 sps:$4 sm:$0xff]   ;;  %v840_v39 = vld [vmem:[%s1291_s0 + $0x60] ss:$8 sps:$4 sm:$0xff]  }
   0xd   :  { %v835_v36 = vld [vmem:[%s1291_s0 + $0xd0] ss:$8 sps:$4 sm:$0xff]   ;;  %v838_v38 = vld [vmem:[%s1291_s0 + $0xe4] ss:$8 sps:$4 sm:$0xff]   ;;  %v841_v40 = vld [vmem:[%s1291_s0 + $0xe0] ss:$8 sps:$4 sm:$0xff]  }
   0xe   :  { %341 = vmatpush1.bf16.msra.mxu0 %v792_v4  ;;  %780 = vmatpush1.bf16.msra.mxu1 %v792_v4  ;;  %v842_v41 = vld [vmem:[%s1291_s0 + $0x74] ss:$8 sps:$4 sm:$0xff]   ;;  %v846_v43 = vld [vmem:[%s1291_s0 + $0x70] ss:$8 sps:$4 sm:$0xff]   ;;  %v1027_v45 = vld [vmem:[%s1292_s2] ss:$0 sm:$0xff] }
   0xf   :  { %342 = vmatprep.subr.bf16.mxu0 %v848_v0  ;;  %770 = vmatprep.subr.bf16.mxu1 %v848_v0  ;;  %v844_v42 = vld [vmem:[%s1291_s0 + $0xf4] ss:$8 sps:$4 sm:$0x1f]   ;;  %v847_v44 = vld [vmem:[%s1291_s0 + $0xf0] ss:$8 sps:$4 sm:$0x1f]  }
  0x10   :  { %v1032_v47 = vld [vmem:[%s1293_s3] ss:$0 sm:$0xff]  ;;  %v606_v3 = vld [vmem:[%s1294_s4 + $0x8] sm:$0xff] }
  0x11   :  { %v605_v61 = vld [vmem:[%s1294_s4] sm:$0xff]  ;;  %v622_v4 = vld [vmem:[%s1294_s4 + $0x88] sm:$0xff] }
  0x12   :  { %343 = vmatpush1.bf16.msra.mxu0 %v793_v7  ;;  %781 = vmatpush1.bf16.msra.mxu1 %v793_v7  ;;  %v621_v62 = vld [vmem:[%s1294_s4 + $0x80] sm:$0xff] }
  0x13   :  { %344 = vmatprep.subr.bf16.mxu0 %v848_v0  ;;  %771 = vmatprep.subr.bf16.mxu1 %v848_v0 }
  0x16   :  { %345 = vmatpush1.bf16.msra.mxu0 %v794_v8  ;;  %782 = vmatpush1.bf16.msra.mxu1 %v794_v8 }
  0x17   :  { %346 = vmatprep.subr.bf16.mxu0 %v848_v0  ;;  %772 = vmatprep.subr.bf16.mxu1 %v848_v0 }
  0x1a   :  { %347 = vmatpush1.bf16.msra.mxu0 %v795_v9  ;;  %783 = vmatpush1.bf16.msra.mxu1 %v795_v9 }
  0x1b   :  { %348 = vmatprep.subr.bf16.mxu0 %v848_v0  ;;  %773 = vmatprep.subr.bf16.mxu1 %v848_v0 }
  0x1e   :  { %349 = vmatpush1.bf16.msra.mxu0 %v796_v10  ;;  %784 = vmatpush1.bf16.msra.mxu1 %v796_v10 }
  0x1f   :  { %350 = vmatprep.subr.bf16.mxu0 %v848_v0  ;;  %774 = vmatprep.subr.bf16.mxu1 %v848_v0 }
  0x22   :  { %351 = vmatpush1.bf16.msra.mxu0 %v797_v11  ;;  %785 = vmatpush1.bf16.msra.mxu1 %v797_v11 }
  0x23   :  { %352 = vmatprep.subr.bf16.mxu0 %v848_v0  ;;  %775 = vmatprep.subr.bf16.mxu1 %v848_v0 }
  0x26   :  { %353 = vmatpush1.bf16.msra.mxu0 %v798_v12  ;;  %786 = vmatpush1.bf16.msra.mxu1 %v798_v12 }
  0x27   :  { %354 = vmatprep.subr.bf16.mxu0 %v848_v0  ;;  %776 = vmatprep.subr.bf16.mxu1 %v848_v0 }
  0x2a   :  { %355 = vmatpush1.bf16.msra.mxu0 %v332_v14  ;;  %787 = vmatpush1.bf16.msra.mxu1 %v332_v14 }
  0x2d   :  { %367 = vmatmul.mubr.bf16.vlgmr.msra.gmra.mrb[0].mxu0 %v800_v15  ;;  %431 = vmatmul.mubr.bf16.vlgmr.msra.gmra.mrb[0].mxu1 %v803_v16 }
  0x2e   :  { %749 = vmatprep.mubr.msk.bf16.mxu0 %vm281_vm0, %v806_v17  ;;  %757 = vmatprep.mubr.msk.bf16.mxu1 %vm281_vm0, %v808_v18 }
  0x35   :  { %375 = vmatmul.mubr.bf16.gmra.mrb[4].mxu0 %v810_v19  ;;  %439 = vmatmul.mubr.bf16.gmra.mrb[4].mxu1 %v811_v20 }
  0x36   :  { %750 = vmatprep.mubr.msk.bf16.mxu0 %vm281_vm0, %v812_v21  ;;  %758 = vmatprep.mubr.msk.bf16.mxu1 %vm281_vm0, %v814_v22 }
  0x3d   :  { %383 = vmatmul.mubr.bf16.gmra.mrb[8].mxu0 %v816_v23  ;;  %447 = vmatmul.mubr.bf16.gmra.mrb[8].mxu1 %v817_v24 }
  0x3e   :  { %751 = vmatprep.mubr.msk.bf16.mxu0 %vm281_vm0, %v818_v25  ;;  %759 = vmatprep.mubr.msk.bf16.mxu1 %vm281_vm0, %v820_v26  ;;  %v607_v25 = vld [vmem:[%s1294_s4 + $0x10] sm:$0xff] }
  0x3f   :  { %v623_v26 = vld [vmem:[%s1294_s4 + $0x90] sm:$0xff] }
  0x45   :  { %391 = vmatmul.mubr.bf16.gmra.mrb[12].mxu0 %v822_v27  ;;  %455 = vmatmul.mubr.bf16.gmra.mrb[12].mxu1 %v823_v28 }
  0x46   :  { %752 = vmatprep.mubr.msk.bf16.mxu0 %vm281_vm0, %v824_v29  ;;  %760 = vmatprep.mubr.msk.bf16.mxu1 %vm281_vm0, %v826_v30 }
  0x4d   :  { %399 = vmatmul.mubr.bf16.gmra.mrb[16].mxu0 %v828_v31  ;;  %463 = vmatmul.mubr.bf16.gmra.mrb[16].mxu1 %v829_v32  ;;  %v608_v31 = vld [vmem:[%s1294_s4 + $0x18] sm:$0xff] }
  0x4e   :  { %753 = vmatprep.mubr.msk.bf16.mxu0 %vm281_vm0, %v830_v33  ;;  %761 = vmatprep.mubr.msk.bf16.mxu1 %vm281_vm0, %v832_v34  ;;  %v624_v32 = vld [vmem:[%s1294_s4 + $0x98] sm:$0xff] }
  0x55   :  { %407 = vmatmul.mubr.bf16.gmra.mrb[20].mxu0 %v834_v35  ;;  %471 = vmatmul.mubr.bf16.gmra.mrb[20].mxu1 %v835_v36 }
  0x56   :  { %754 = vmatprep.mubr.msk.bf16.mxu0 %vm281_vm0, %v836_v37  ;;  %762 = vmatprep.mubr.msk.bf16.mxu1 %vm281_vm0, %v838_v38 }
  0x5d   :  { %415 = vmatmul.mubr.bf16.gmra.mrb[24].mxu0 %v840_v39  ;;  %479 = vmatmul.mubr.bf16.gmra.mrb[24].mxu1 %v841_v40 }
  0x5e   :  { %755 = vmatprep.mubr.msk.bf16.mxu0 %vm281_vm0, %v842_v41  ;;  %763 = vmatprep.mubr.msk.bf16.mxu1 %vm281_vm0, %v844_v42 }
  0x65   :  { %423 = vmatmul.mubr.bf16.gmra.mrb[28].mxu0 %v846_v43  ;;  %487 = vmatmul.mubr.bf16.gmra.mrb[28].mxu1 %v847_v44 }
 0x100   :  { %v368_v46 = vpop.f32.mrb[0].mxu0  ;;  %v432_v48 = vpop.f32.mrb[0].mxu1 }
 0x101   :  { %v502_v49 = vmul.f32 %v1027_v45, %v368_v46  ;;  %v518_v50 = vmul.f32 %v1027_v45, %v432_v48  ;;  %v370_v51 = vpop.f32.mrb[1].mxu0  ;;  %v434_v52 = vpop.f32.mrb[1].mxu1 }
 0x102   :  { %v371_v53 = vpop.f32.mrb[2].mxu0  ;;  %v435_v54 = vpop.f32.mrb[2].mxu1 }
 0x103   :  { %v541_v55 = vadd.f32 %v1032_v47, %v502_v49  ;;  %v557_v56 = vadd.f32 %v1032_v47, %v518_v50  ;;  %v503_v57 = vmul.f32 %v1027_v45, %v371_v53  ;;  %v519_v58 = vmul.f32 %v1027_v45, %v435_v54  ;;  %v373_v59 = vpop.f32.mrb[3].mxu0  ;;  %v437_v60 = vpop.f32.mrb[3].mxu1 }
 0x105   :  { %v573_v63 = vmax.f32 %v541_v55, 0.0  ;;  %v589_v0 = vmax.f32 %v557_v56, 0.0  ;;  %v542_v1 = vadd.f32 %v1032_v47, %v503_v57  ;;  %v558_v2 = vadd.f32 %v1032_v47, %v519_v58  ;;  %v609_v55 = vld [vmem:[%s1294_s4 + $0x20] sm:$0xff] }
 0x106   :  { %v625_v56 = vld [vmem:[%s1294_s4 + $0xa0] sm:$0xff] }
 0x107   :  { %v637_v5 = vadd.f32 %v605_v61, %v573_v63  ;;  %v653_v6 = vadd.f32 %v621_v62, %v589_v0  ;;  %v574_v7 = vmax.f32 %v542_v1, 0.0  ;;  %v590_v8 = vmax.f32 %v558_v2, 0.0  ;;  %v610_v61 = vld [vmem:[%s1294_s4 + $0x28] sm:$0xff] }
 0x108   :  { %v376_v9 = vpop.f32.mrb[4].mxu0  ;;  %v440_v10 = vpop.f32.mrb[4].mxu1  ;;  %v626_v62 = vld [vmem:[%s1294_s4 + $0xa8] sm:$0xff] }
 0x109   :  { %669 = vst [vmem:[%s1295_s5] sm:$0xff] %v637_v5  ;;  %685 = vst [vmem:[%s1295_s5 + $0x80] sm:$0xff] %v653_v6  ;;  %v638_v11 = vadd.f32 %v606_v3, %v574_v7  ;;  %v654_v12 = vadd.f32 %v622_v4, %v590_v8  ;;  %v504_v13 = vmul.f32 %v1027_v45, %v376_v9  ;;  %v378_v15 = vpop.f32.mrb[5].mxu0  ;;  %v442_v16 = vpop.f32.mrb[5].mxu1 }
 0x10a   :  { %v520_v14 = vmul.f32 %v1027_v45, %v440_v10  ;;  %v379_v17 = vpop.f32.mrb[6].mxu0  ;;  %v443_v18 = vpop.f32.mrb[6].mxu1 }
 0x10b   :  { %670 = vst [vmem:[%s1295_s5 + $0x8] sm:$0xff] %v638_v11  ;;  %686 = vst [vmem:[%s1295_s5 + $0x88] sm:$0xff] %v654_v12  ;;  %v543_v19 = vadd.f32 %v1032_v47, %v504_v13  ;;  %v505_v21 = vmul.f32 %v1027_v45, %v379_v17  ;;  %v521_v22 = vmul.f32 %v1027_v45, %v443_v18  ;;  %v381_v23 = vpop.f32.mrb[7].mxu0  ;;  %v445_v24 = vpop.f32.mrb[7].mxu1 }
 0x10c   :  { %v559_v20 = vadd.f32 %v1032_v47, %v520_v14 }
 0x10d   :  { %v575_v27 = vmax.f32 %v543_v19, 0.0  ;;  %v544_v29 = vadd.f32 %v1032_v47, %v505_v21  ;;  %v560_v30 = vadd.f32 %v1032_v47, %v521_v22  ;;  %v611_v19 = vld [vmem:[%s1294_s4 + $0x30] sm:$0xff] }
 0x10e   :  { %v591_v28 = vmax.f32 %v559_v20, 0.0  ;;  %v627_v20 = vld [vmem:[%s1294_s4 + $0xb0] sm:$0xff] }
 0x10f   :  { %v639_v33 = vadd.f32 %v607_v25, %v575_v27  ;;  %v576_v35 = vmax.f32 %v544_v29, 0.0  ;;  %v592_v36 = vmax.f32 %v560_v30, 0.0  ;;  %v612_v25 = vld [vmem:[%s1294_s4 + $0x38] sm:$0xff] }
 0x110   :  { %v655_v34 = vadd.f32 %v623_v26, %v591_v28  ;;  %v384_v37 = vpop.f32.mrb[8].mxu0  ;;  %v448_v38 = vpop.f32.mrb[8].mxu1  ;;  %v628_v26 = vld [vmem:[%s1294_s4 + $0xb8] sm:$0xff] }
 0x111   :  { %671 = vst [vmem:[%s1295_s5 + $0x10] sm:$0xff] %v639_v33  ;;  %v640_v39 = vadd.f32 %v608_v31, %v576_v35  ;;  %v656_v40 = vadd.f32 %v624_v32, %v592_v36  ;;  %v506_v41 = vmul.f32 %v1027_v45, %v384_v37  ;;  %v522_v42 = vmul.f32 %v1027_v45, %v448_v38  ;;  %v386_v43 = vpop.f32.mrb[9].mxu0  ;;  %v450_v44 = vpop.f32.mrb[9].mxu1 }
 0x112   :  { %687 = vst [vmem:[%s1295_s5 + $0x90] sm:$0xff] %v655_v34  ;;  %v387_v46 = vpop.f32.mrb[10].mxu0  ;;  %v451_v48 = vpop.f32.mrb[10].mxu1 }
 0x113   :  { %672 = vst [vmem:[%s1295_s5 + $0x18] sm:$0xff] %v640_v39  ;;  %688 = vst [vmem:[%s1295_s5 + $0x98] sm:$0xff] %v656_v40  ;;  %v545_v49 = vadd.f32 %v1032_v47, %v506_v41  ;;  %v561_v50 = vadd.f32 %v1032_v47, %v522_v42  ;;  %v507_v51 = vmul.f32 %v1027_v45, %v387_v46  ;;  %v389_v53 = vpop.f32.mrb[11].mxu0  ;;  %v453_v54 = vpop.f32.mrb[11].mxu1 }
 0x114   :  { %v523_v52 = vmul.f32 %v1027_v45, %v451_v48 }
 0x115   :  { %v577_v57 = vmax.f32 %v545_v49, 0.0  ;;  %v593_v58 = vmax.f32 %v561_v50, 0.0  ;;  %v546_v59 = vadd.f32 %v1032_v47, %v507_v51  ;;  %v613_v49 = vld [vmem:[%s1294_s4 + $0x40] sm:$0xff] }
 0x116   :  { %v562_v60 = vadd.f32 %v1032_v47, %v523_v52  ;;  %v629_v50 = vld [vmem:[%s1294_s4 + $0xc0] sm:$0xff] }
 0x117   :  { %v641_v63 = vadd.f32 %v609_v55, %v577_v57  ;;  %v657_v0 = vadd.f32 %v625_v56, %v593_v58  ;;  %v578_v1 = vmax.f32 %v546_v59, 0.0  ;;  %v614_v55 = vld [vmem:[%s1294_s4 + $0x48] sm:$0xff] }
 0x118   :  { %v594_v2 = vmax.f32 %v562_v60, 0.0  ;;  %v392_v3 = vpop.f32.mrb[12].mxu0  ;;  %v456_v4 = vpop.f32.mrb[12].mxu1  ;;  %v630_v56 = vld [vmem:[%s1294_s4 + $0xc8] sm:$0xff] }
 0x119   :  { %673 = vst [vmem:[%s1295_s5 + $0x20] sm:$0xff] %v641_v63  ;;  %689 = vst [vmem:[%s1295_s5 + $0xa0] sm:$0xff] %v657_v0  ;;  %v642_v5 = vadd.f32 %v610_v61, %v578_v1  ;;  %v508_v7 = vmul.f32 %v1027_v45, %v392_v3  ;;  %v524_v8 = vmul.f32 %v1027_v45, %v456_v4  ;;  %v394_v9 = vpop.f32.mrb[13].mxu0  ;;  %v458_v10 = vpop.f32.mrb[13].mxu1 }
 0x11a   :  { %v658_v6 = vadd.f32 %v626_v62, %v594_v2  ;;  %v395_v11 = vpop.f32.mrb[14].mxu0  ;;  %v459_v12 = vpop.f32.mrb[14].mxu1 }
 0x11b   :  { %674 = vst [vmem:[%s1295_s5 + $0x28] sm:$0xff] %v642_v5  ;;  %v547_v13 = vadd.f32 %v1032_v47, %v508_v7  ;;  %v563_v14 = vadd.f32 %v1032_v47, %v524_v8  ;;  %v509_v15 = vmul.f32 %v1027_v45, %v395_v11  ;;  %v525_v16 = vmul.f32 %v1027_v45, %v459_v12  ;;  %v397_v17 = vpop.f32.mrb[15].mxu0  ;;  %v461_v18 = vpop.f32.mrb[15].mxu1 }
 0x11c   :  { %690 = vst [vmem:[%s1295_s5 + $0xa8] sm:$0xff] %v658_v6 }
 0x11d   :  { %v579_v21 = vmax.f32 %v547_v13, 0.0  ;;  %v595_v22 = vmax.f32 %v563_v14, 0.0  ;;  %v548_v23 = vadd.f32 %v1032_v47, %v509_v15  ;;  %v564_v24 = vadd.f32 %v1032_v47, %v525_v16  ;;  %v615_v13 = vld [vmem:[%s1294_s4 + $0x50] sm:$0xff] }
 0x11e   :  { %v631_v14 = vld [vmem:[%s1294_s4 + $0xd0] sm:$0xff] }
 0x11f   :  { %v643_v27 = vadd.f32 %v611_v19, %v579_v21  ;;  %v659_v28 = vadd.f32 %v627_v20, %v595_v22  ;;  %v580_v29 = vmax.f32 %v548_v23, 0.0  ;;  %v596_v30 = vmax.f32 %v564_v24, 0.0  ;;  %v616_v19 = vld [vmem:[%s1294_s4 + $0x58] sm:$0xff] }
 0x120   :  { %v400_v31 = vpop.f32.mrb[16].mxu0  ;;  %v464_v32 = vpop.f32.mrb[16].mxu1  ;;  %v632_v20 = vld [vmem:[%s1294_s4 + $0xd8] sm:$0xff] }
 0x121   :  { %675 = vst [vmem:[%s1295_s5 + $0x30] sm:$0xff] %v643_v27  ;;  %691 = vst [vmem:[%s1295_s5 + $0xb0] sm:$0xff] %v659_v28  ;;  %v644_v33 = vadd.f32 %v612_v25, %v580_v29  ;;  %v660_v34 = vadd.f32 %v628_v26, %v596_v30  ;;  %v510_v35 = vmul.f32 %v1027_v45, %v400_v31  ;;  %v402_v37 = vpop.f32.mrb[17].mxu0  ;;  %v466_v38 = vpop.f32.mrb[17].mxu1 }
 0x122   :  { %v526_v36 = vmul.f32 %v1027_v45, %v464_v32  ;;  %v403_v39 = vpop.f32.mrb[18].mxu0  ;;  %v467_v40 = vpop.f32.mrb[18].mxu1 }
 0x123   :  { %676 = vst [vmem:[%s1295_s5 + $0x38] sm:$0xff] %v644_v33  ;;  %692 = vst [vmem:[%s1295_s5 + $0xb8] sm:$0xff] %v660_v34  ;;  %v549_v41 = vadd.f32 %v1032_v47, %v510_v35  ;;  %v511_v43 = vmul.f32 %v1027_v45, %v403_v39  ;;  %v527_v44 = vmul.f32 %v1027_v45, %v467_v40  ;;  %v405_v46 = vpop.f32.mrb[19].mxu0  ;;  %v469_v48 = vpop.f32.mrb[19].mxu1 }
 0x124   :  { %v565_v42 = vadd.f32 %v1032_v47, %v526_v36 }
 0x125   :  { %v581_v51 = vmax.f32 %v549_v41, 0.0  ;;  %v550_v53 = vadd.f32 %v1032_v47, %v511_v43  ;;  %v566_v54 = vadd.f32 %v1032_v47, %v527_v44  ;;  %v617_v41 = vld [vmem:[%s1294_s4 + $0x60] sm:$0xff] }
 0x126   :  { %v597_v52 = vmax.f32 %v565_v42, 0.0  ;;  %v633_v42 = vld [vmem:[%s1294_s4 + $0xe0] sm:$0xff] }
 0x127   :  { %v645_v57 = vadd.f32 %v613_v49, %v581_v51  ;;  %v582_v59 = vmax.f32 %v550_v53, 0.0  ;;  %v598_v60 = vmax.f32 %v566_v54, 0.0  ;;  %v618_v49 = vld [vmem:[%s1294_s4 + $0x68] sm:$0xff] }
 0x128   :  { %v661_v58 = vadd.f32 %v629_v50, %v597_v52  ;;  %v408_v61 = vpop.f32.mrb[20].mxu0  ;;  %v472_v62 = vpop.f32.mrb[20].mxu1  ;;  %v634_v50 = vld [vmem:[%s1294_s4 + $0xe8] sm:$0xff] }
 0x129   :  { %677 = vst [vmem:[%s1295_s5 + $0x40] sm:$0xff] %v645_v57  ;;  %v646_v63 = vadd.f32 %v614_v55, %v582_v59  ;;  %v662_v0 = vadd.f32 %v630_v56, %v598_v60  ;;  %v512_v1 = vmul.f32 %v1027_v45, %v408_v61  ;;  %v528_v2 = vmul.f32 %v1027_v45, %v472_v62  ;;  %v410_v3 = vpop.f32.mrb[21].mxu0  ;;  %v474_v4 = vpop.f32.mrb[21].mxu1 }
 0x12a   :  { %693 = vst [vmem:[%s1295_s5 + $0xc0] sm:$0xff] %v661_v58  ;;  %v411_v5 = vpop.f32.mrb[22].mxu0  ;;  %v475_v6 = vpop.f32.mrb[22].mxu1 }
 0x12b   :  { %678 = vst [vmem:[%s1295_s5 + $0x48] sm:$0xff] %v646_v63  ;;  %694 = vst [vmem:[%s1295_s5 + $0xc8] sm:$0xff] %v662_v0  ;;  %v551_v7 = vadd.f32 %v1032_v47, %v512_v1  ;;  %v567_v8 = vadd.f32 %v1032_v47, %v528_v2  ;;  %v513_v9 = vmul.f32 %v1027_v45, %v411_v5  ;;  %v413_v11 = vpop.f32.mrb[23].mxu0  ;;  %v477_v12 = vpop.f32.mrb[23].mxu1 }
 0x12c   :  { %v529_v10 = vmul.f32 %v1027_v45, %v475_v6 }
 0x12d   :  { %v583_v15 = vmax.f32 %v551_v7, 0.0  ;;  %v599_v16 = vmax.f32 %v567_v8, 0.0  ;;  %v552_v17 = vadd.f32 %v1032_v47, %v513_v9  ;;  %v619_v7 = vld [vmem:[%s1294_s4 + $0x70] sm:$0xff] }
 0x12e   :  { %v568_v18 = vadd.f32 %v1032_v47, %v529_v10  ;;  %v635_v8 = vld [vmem:[%s1294_s4 + $0xf0] sm:$0xff] }
 0x12f   :  { %v647_v21 = vadd.f32 %v615_v13, %v583_v15  ;;  %v663_v22 = vadd.f32 %v631_v14, %v599_v16  ;;  %v584_v23 = vmax.f32 %v552_v17, 0.0  ;;  %v636_v13 = vld [vmem:[%s1294_s4 + $0xf8] sm:$0x3] }
 0x130   :  { %v600_v24 = vmax.f32 %v568_v18, 0.0  ;;  %v416_v25 = vpop.f32.mrb[24].mxu0  ;;  %v480_v26 = vpop.f32.mrb[24].mxu1 }
 0x131   :  { %679 = vst [vmem:[%s1295_s5 + $0x50] sm:$0xff] %v647_v21  ;;  %695 = vst [vmem:[%s1295_s5 + $0xd0] sm:$0xff] %v663_v22  ;;  %v648_v27 = vadd.f32 %v616_v19, %v584_v23  ;;  %v514_v29 = vmul.f32 %v1027_v45, %v416_v25  ;;  %v530_v30 = vmul.f32 %v1027_v45, %v480_v26  ;;  %v418_v31 = vpop.f32.mrb[25].mxu0  ;;  %v482_v32 = vpop.f32.mrb[25].mxu1 }
 0x132   :  { %v664_v28 = vadd.f32 %v632_v20, %v600_v24  ;;  %v419_v33 = vpop.f32.mrb[26].mxu0  ;;  %v483_v34 = vpop.f32.mrb[26].mxu1 }
 0x133   :  { %680 = vst [vmem:[%s1295_s5 + $0x58] sm:$0xff] %v648_v27  ;;  %v553_v35 = vadd.f32 %v1032_v47, %v514_v29  ;;  %v569_v36 = vadd.f32 %v1032_v47, %v530_v30  ;;  %v515_v37 = vmul.f32 %v1027_v45, %v419_v33  ;;  %v531_v38 = vmul.f32 %v1027_v45, %v483_v34  ;;  %v421_v39 = vpop.f32.mrb[27].mxu0  ;;  %v485_v40 = vpop.f32.mrb[27].mxu1 }
 0x134   :  { %696 = vst [vmem:[%s1295_s5 + $0xd8] sm:$0xff] %v664_v28 }
 0x135   :  { %v585_v43 = vmax.f32 %v553_v35, 0.0  ;;  %v601_v44 = vmax.f32 %v569_v36, 0.0  ;;  %v554_v46 = vadd.f32 %v1032_v47, %v515_v37  ;;  %v570_v48 = vadd.f32 %v1032_v47, %v531_v38 }
 0x137   :  { %v649_v51 = vadd.f32 %v617_v41, %v585_v43  ;;  %v665_v52 = vadd.f32 %v633_v42, %v601_v44  ;;  %v586_v53 = vmax.f32 %v554_v46, 0.0  ;;  %v602_v54 = vmax.f32 %v570_v48, 0.0 }
 0x138   :  { %v424_v55 = vpop.f32.mrb[28].mxu0  ;;  %v488_v56 = vpop.f32.mrb[28].mxu1 }
 0x139   :  { %681 = vst [vmem:[%s1295_s5 + $0x60] sm:$0xff] %v649_v51  ;;  %697 = vst [vmem:[%s1295_s5 + $0xe0] sm:$0xff] %v665_v52  ;;  %v650_v57 = vadd.f32 %v618_v49, %v586_v53  ;;  %v666_v58 = vadd.f32 %v634_v50, %v602_v54  ;;  %v516_v59 = vmul.f32 %v1027_v45, %v424_v55  ;;  %v426_v61 = vpop.f32.mrb[29].mxu0  ;;  %v490_v62 = vpop.f32.mrb[29].mxu1 }
 0x13a   :  { %v532_v60 = vmul.f32 %v1027_v45, %v488_v56  ;;  %v427_v63 = vpop.f32.mrb[30].mxu0  ;;  %v491_v0 = vpop.f32.mrb[30].mxu1 }
 0x13b   :  { %682 = vst [vmem:[%s1295_s5 + $0x68] sm:$0xff] %v650_v57  ;;  %698 = vst [vmem:[%s1295_s5 + $0xe8] sm:$0xff] %v666_v58  ;;  %v555_v1 = vadd.f32 %v1032_v47, %v516_v59  ;;  %v517_v3 = vmul.f32 %v1027_v45, %v427_v63  ;;  %v533_v4 = vmul.f32 %v1027_v45, %v491_v0  ;;  %v429_v5 = vpop.f32.mrb[31].mxu0  ;;  %v493_v6 = vpop.f32.mrb[31].mxu1  ;;  %v620_v45 = vld [vmem:[%s1294_s4 + $0x78] sm:$0xff] }
 0x13c   :  { %v571_v2 = vadd.f32 %v1032_v47, %v532_v60 }
 0x13d   :  { %v587_v9 = vmax.f32 %v555_v1, 0.0  ;;  %v556_v11 = vadd.f32 %v1032_v47, %v517_v3  ;;  %v572_v12 = vadd.f32 %v1032_v47, %v533_v4 }
 0x13e   :  { %v603_v10 = vmax.f32 %v571_v2, 0.0 }
 0x13f   :  { %v651_v14 = vadd.f32 %v619_v7, %v587_v9  ;;  %v588_v16 = vmax.f32 %v556_v11, 0.0  ;;  %v604_v17 = vmax.f32 %v572_v12, 0.0 }
 0x140   :  { %v667_v15 = vadd.f32 %v635_v8, %v603_v10 }
 0x141   :  { %683 = vst [vmem:[%s1295_s5 + $0x70] sm:$0xff] %v651_v14  ;;  %v652_v47 = vadd.f32 %v620_v45, %v588_v16  ;;  %v668_v18 = vadd.f32 %v636_v13, %v604_v17 }
 0x142   :  { %699 = vst [vmem:[%s1295_s5 + $0xf0] sm:$0xff] %v667_v15 }
 0x143   :  { %684 = vst [vmem:[%s1295_s5 + $0x78] sm:$0xff] %v652_v47  ;;  %700 = vst [vmem:[%s1295_s5 + $0xf8] sm:$0x3] %v668_v18 }

// kernel: ssrn_forward.11
= control target key start
LH: loop header
LB: loop body
LE: loop exit
PB: predicated region body
PF: predicated region fallthrough
CT: control target
= control target key end

     0   :  { %v781_v0 = vmov 0   ;;  %vm278_vm0 = vcmask 326656   ;;  %vm327_vm1 = vcmask 1043456   ;;  %s1122_s1 = inlined_call_operand.vmem [shape: bf16[168,128], index: 1, kind: input, shape index: {}]   ;;  %s1123_s0 = inlined_call_operand.vmem [shape: bf16[250,168], index: 0, kind: input, shape index: {}]   ;;  %s1124_s2 = inlined_call_operand.vmem [shape: f32[1,128], index: 2, kind: input, shape index: {}]   ;;  %s1125_s3 = inlined_call_operand.vmem [shape: f32[1,128], index: 3, kind: input, shape index: {}]   ;;  %s1126_s4 = inlined_call_operand.vmem [shape: f32[250,128], index: 4, kind: output, shape index: {}]  }
   0x1   :  { %331 = vmatprep.subr.bf16.mxu0 %v781_v0  ;;  %699 = vmatprep.subr.bf16.mxu1 %v781_v0  ;;  %v722_v1 = vld [vmem:[%s1122_s1] sm:$0xff]   ;;  %v723_v2 = vld [vmem:[%s1122_s1 + $0x8] sm:$0xff]   ;;  %v724_v3 = vld [vmem:[%s1122_s1 + $0x10] sm:$0xff]  }
   0x2   :  { %332 = vmatpush1.bf16.msra.mxu0 %v722_v1  ;;  %710 = vmatpush1.bf16.msra.mxu1 %v722_v1  ;;  %v725_v4 = vld [vmem:[%s1122_s1 + $0x18] sm:$0xff]   ;;  %v735_v5 = vld [vmem:[%s1123_s0 + $0x4] ss:$8 sps:$4 sm:$0xff]   ;;  %v728_v9 = vld [vmem:[%s1122_s1 + $0x30] sm:$0xff]  }
   0x3   :  { %333 = vmatprep.subr.bf16.mxu0 %v781_v0  ;;  %700 = vmatprep.subr.bf16.mxu1 %v781_v0  ;;  %v738_v6 = vld [vmem:[%s1123_s0 + $0x84] ss:$8 sps:$4 sm:$0xff]   ;;  %v729_v10 = vld [vmem:[%s1122_s1 + $0x38] sm:$0xff]   ;;  %v732_v13 = vld [vmem:[%s1122_s1 + $0x50] ss:$0 sps:$4 sm:$0xff]  }
   0x4   :  { %681 = vmatprep.mubr.msk.bf16.mxu0 %vm278_vm0, %v735_v5  ;;  %v726_v7 = vld [vmem:[%s1122_s1 + $0x20] sm:$0xff]   ;;  %689 = vmatprep.mubr.msk.bf16.mxu1 %vm278_vm0, %v738_v6  ;;  %v727_v8 = vld [vmem:[%s1122_s1 + $0x28] sm:$0xff]   ;;  %v329_v14 = vsel %vm327_vm1, %v732_v13, 0  ;;  %v739_v17 = vld [vmem:[%s1123_s0 + $0x14] ss:$8 sps:$4 sm:$0xff]  }
   0x5   :  { %v730_v11 = vld [vmem:[%s1122_s1 + $0x40] sm:$0xff]   ;;  %v731_v12 = vld [vmem:[%s1122_s1 + $0x48] sm:$0xff]   ;;  %v741_v18 = vld [vmem:[%s1123_s0 + $0x94] ss:$8 sps:$4 sm:$0xff]  }
   0x6   :  { %334 = vmatpush1.bf16.msra.mxu0 %v723_v2  ;;  %711 = vmatpush1.bf16.msra.mxu1 %v723_v2  ;;  %v733_v15 = vld [vmem:[%s1123_s0] ss:$8 sps:$4 sm:$0xff]   ;;  %v743_v19 = vld [vmem:[%s1123_s0 + $0x10] ss:$8 sps:$4 sm:$0xff]   ;;  %v745_v21 = vld [vmem:[%s1123_s0 + $0x24] ss:$8 sps:$4 sm:$0xff]  }
   0x7   :  { %335 = vmatprep.subr.bf16.mxu0 %v781_v0  ;;  %701 = vmatprep.subr.bf16.mxu1 %v781_v0  ;;  %v736_v16 = vld [vmem:[%s1123_s0 + $0x80] ss:$8 sps:$4 sm:$0xff]   ;;  %v744_v20 = vld [vmem:[%s1123_s0 + $0x90] ss:$8 sps:$4 sm:$0xff]   ;;  %v747_v22 = vld [vmem:[%s1123_s0 + $0xa4] ss:$8 sps:$4 sm:$0xff]  }
   0x8   :  { %v749_v23 = vld [vmem:[%s1123_s0 + $0x20] ss:$8 sps:$4 sm:$0xff]   ;;  %v751_v25 = vld [vmem:[%s1123_s0 + $0x34] ss:$8 sps:$4 sm:$0xff]   ;;  %v755_v27 = vld [vmem:[%s1123_s0 + $0x30] ss:$8 sps:$4 sm:$0xff]  }
   0x9   :  { %v750_v24 = vld [vmem:[%s1123_s0 + $0xa0] ss:$8 sps:$4 sm:$0xff]   ;;  %v753_v26 = vld [vmem:[%s1123_s0 + $0xb4] ss:$8 sps:$4 sm:$0xff]   ;;  %v756_v28 = vld [vmem:[%s1123_s0 + $0xb0] ss:$8 sps:$4 sm:$0xff]  }
   0xa   :  { %336 = vmatpush1.bf16.msra.mxu0 %v724_v3  ;;  %712 = vmatpush1.bf16.msra.mxu1 %v724_v3  ;;  %v757_v29 = vld [vmem:[%s1123_s0 + $0x44] ss:$8 sps:$4 sm:$0xff]   ;;  %v761_v31 = vld [vmem:[%s1123_s0 + $0x40] ss:$8 sps:$4 sm:$0xff]   ;;  %v763_v33 = vld [vmem:[%s1123_s0 + $0x54] ss:$8 sps:$4 sm:$0xff]  }
   0xb   :  { %337 = vmatprep.subr.bf16.mxu0 %v781_v0  ;;  %702 = vmatprep.subr.bf16.mxu1 %v781_v0  ;;  %v759_v30 = vld [vmem:[%s1123_s0 + $0xc4] ss:$8 sps:$4 sm:$0xff]   ;;  %v762_v32 = vld [vmem:[%s1123_s0 + $0xc0] ss:$8 sps:$4 sm:$0xff]   ;;  %v765_v34 = vld [vmem:[%s1123_s0 + $0xd4] ss:$8 sps:$4 sm:$0xff]  }
   0xc   :  { %v767_v35 = vld [vmem:[%s1123_s0 + $0x50] ss:$8 sps:$4 sm:$0xff]   ;;  %v769_v37 = vld [vmem:[%s1123_s0 + $0x64] ss:$8 sps:$4 sm:$0xff]   ;;  %v773_v39 = vld [vmem:[%s1123_s0 + $0x60] ss:$8 sps:$4 sm:$0xff]  }
   0xd   :  { %v768_v36 = vld [vmem:[%s1123_s0 + $0xd0] ss:$8 sps:$4 sm:$0xff]   ;;  %v771_v38 = vld [vmem:[%s1123_s0 + $0xe4] ss:$8 sps:$4 sm:$0xff]   ;;  %v774_v40 = vld [vmem:[%s1123_s0 + $0xe0] ss:$8 sps:$4 sm:$0xff]  }
   0xe   :  { %338 = vmatpush1.bf16.msra.mxu0 %v725_v4  ;;  %713 = vmatpush1.bf16.msra.mxu1 %v725_v4  ;;  %v775_v41 = vld [vmem:[%s1123_s0 + $0x74] ss:$8 sps:$4 sm:$0xff]   ;;  %v779_v43 = vld [vmem:[%s1123_s0 + $0x70] ss:$8 sps:$4 sm:$0xff]   ;;  %v955_v45 = vld [vmem:[%s1124_s2] ss:$0 sm:$0xff] }
   0xf   :  { %339 = vmatprep.subr.bf16.mxu0 %v781_v0  ;;  %703 = vmatprep.subr.bf16.mxu1 %v781_v0  ;;  %v777_v42 = vld [vmem:[%s1123_s0 + $0xf4] ss:$8 sps:$4 sm:$0x1f]   ;;  %v780_v44 = vld [vmem:[%s1123_s0 + $0xf0] ss:$8 sps:$4 sm:$0x1f]  }
  0x10   :  { %v960_v47 = vld [vmem:[%s1125_s3] ss:$0 sm:$0xff] }
  0x12   :  { %340 = vmatpush1.bf16.msra.mxu0 %v726_v7  ;;  %714 = vmatpush1.bf16.msra.mxu1 %v726_v7 }
  0x13   :  { %341 = vmatprep.subr.bf16.mxu0 %v781_v0  ;;  %704 = vmatprep.subr.bf16.mxu1 %v781_v0 }
  0x16   :  { %342 = vmatpush1.bf16.msra.mxu0 %v727_v8  ;;  %715 = vmatpush1.bf16.msra.mxu1 %v727_v8 }
  0x17   :  { %343 = vmatprep.subr.bf16.mxu0 %v781_v0  ;;  %705 = vmatprep.subr.bf16.mxu1 %v781_v0 }
  0x1a   :  { %344 = vmatpush1.bf16.msra.mxu0 %v728_v9  ;;  %716 = vmatpush1.bf16.msra.mxu1 %v728_v9 }
  0x1b   :  { %345 = vmatprep.subr.bf16.mxu0 %v781_v0  ;;  %706 = vmatprep.subr.bf16.mxu1 %v781_v0 }
  0x1e   :  { %346 = vmatpush1.bf16.msra.mxu0 %v729_v10  ;;  %717 = vmatpush1.bf16.msra.mxu1 %v729_v10 }
  0x1f   :  { %347 = vmatprep.subr.bf16.mxu0 %v781_v0  ;;  %707 = vmatprep.subr.bf16.mxu1 %v781_v0 }
  0x22   :  { %348 = vmatpush1.bf16.msra.mxu0 %v730_v11  ;;  %718 = vmatpush1.bf16.msra.mxu1 %v730_v11 }
  0x23   :  { %349 = vmatprep.subr.bf16.mxu0 %v781_v0  ;;  %708 = vmatprep.subr.bf16.mxu1 %v781_v0 }
  0x26   :  { %350 = vmatpush1.bf16.msra.mxu0 %v731_v12  ;;  %719 = vmatpush1.bf16.msra.mxu1 %v731_v12 }
  0x27   :  { %351 = vmatprep.subr.bf16.mxu0 %v781_v0  ;;  %709 = vmatprep.subr.bf16.mxu1 %v781_v0 }
  0x2a   :  { %352 = vmatpush1.bf16.msra.mxu0 %v329_v14  ;;  %720 = vmatpush1.bf16.msra.mxu1 %v329_v14 }
  0x2d   :  { %364 = vmatmul.mubr.bf16.vlgmr.msra.gmra.mrb[0].mxu0 %v733_v15  ;;  %428 = vmatmul.mubr.bf16.vlgmr.msra.gmra.mrb[0].mxu1 %v736_v16 }
  0x2e   :  { %682 = vmatprep.mubr.msk.bf16.mxu0 %vm278_vm0, %v739_v17  ;;  %690 = vmatprep.mubr.msk.bf16.mxu1 %vm278_vm0, %v741_v18 }
  0x35   :  { %372 = vmatmul.mubr.bf16.gmra.mrb[4].mxu0 %v743_v19  ;;  %436 = vmatmul.mubr.bf16.gmra.mrb[4].mxu1 %v744_v20 }
  0x36   :  { %683 = vmatprep.mubr.msk.bf16.mxu0 %vm278_vm0, %v745_v21  ;;  %691 = vmatprep.mubr.msk.bf16.mxu1 %vm278_vm0, %v747_v22 }
  0x3d   :  { %380 = vmatmul.mubr.bf16.gmra.mrb[8].mxu0 %v749_v23  ;;  %444 = vmatmul.mubr.bf16.gmra.mrb[8].mxu1 %v750_v24 }
  0x3e   :  { %684 = vmatprep.mubr.msk.bf16.mxu0 %vm278_vm0, %v751_v25  ;;  %692 = vmatprep.mubr.msk.bf16.mxu1 %vm278_vm0, %v753_v26 }
  0x45   :  { %388 = vmatmul.mubr.bf16.gmra.mrb[12].mxu0 %v755_v27  ;;  %452 = vmatmul.mubr.bf16.gmra.mrb[12].mxu1 %v756_v28 }
  0x46   :  { %685 = vmatprep.mubr.msk.bf16.mxu0 %vm278_vm0, %v757_v29  ;;  %693 = vmatprep.mubr.msk.bf16.mxu1 %vm278_vm0, %v759_v30 }
  0x4d   :  { %396 = vmatmul.mubr.bf16.gmra.mrb[16].mxu0 %v761_v31  ;;  %460 = vmatmul.mubr.bf16.gmra.mrb[16].mxu1 %v762_v32 }
  0x4e   :  { %686 = vmatprep.mubr.msk.bf16.mxu0 %vm278_vm0, %v763_v33  ;;  %694 = vmatprep.mubr.msk.bf16.mxu1 %vm278_vm0, %v765_v34 }
  0x55   :  { %404 = vmatmul.mubr.bf16.gmra.mrb[20].mxu0 %v767_v35  ;;  %468 = vmatmul.mubr.bf16.gmra.mrb[20].mxu1 %v768_v36 }
  0x56   :  { %687 = vmatprep.mubr.msk.bf16.mxu0 %vm278_vm0, %v769_v37  ;;  %695 = vmatprep.mubr.msk.bf16.mxu1 %vm278_vm0, %v771_v38 }
  0x5d   :  { %412 = vmatmul.mubr.bf16.gmra.mrb[24].mxu0 %v773_v39  ;;  %476 = vmatmul.mubr.bf16.gmra.mrb[24].mxu1 %v774_v40 }
  0x5e   :  { %688 = vmatprep.mubr.msk.bf16.mxu0 %vm278_vm0, %v775_v41  ;;  %696 = vmatprep.mubr.msk.bf16.mxu1 %vm278_vm0, %v777_v42 }
  0x65   :  { %420 = vmatmul.mubr.bf16.gmra.mrb[28].mxu0 %v779_v43  ;;  %484 = vmatmul.mubr.bf16.gmra.mrb[28].mxu1 %v780_v44 }
 0x100   :  { %v365_v46 = vpop.f32.mrb[0].mxu0  ;;  %v429_v48 = vpop.f32.mrb[0].mxu1 }
 0x101   :  { %v499_v49 = vmul.f32 %v955_v45, %v365_v46  ;;  %v515_v50 = vmul.f32 %v955_v45, %v429_v48  ;;  %v367_v51 = vpop.f32.mrb[1].mxu0  ;;  %v431_v52 = vpop.f32.mrb[1].mxu1 }
 0x102   :  { %v368_v53 = vpop.f32.mrb[2].mxu0  ;;  %v432_v54 = vpop.f32.mrb[2].mxu1 }
 0x103   :  { %v538_v55 = vadd.f32 %v960_v47, %v499_v49  ;;  %v554_v56 = vadd.f32 %v960_v47, %v515_v50  ;;  %v500_v57 = vmul.f32 %v955_v45, %v368_v53  ;;  %v516_v58 = vmul.f32 %v955_v45, %v432_v54  ;;  %v370_v59 = vpop.f32.mrb[3].mxu0  ;;  %v434_v60 = vpop.f32.mrb[3].mxu1 }
 0x105   :  { %v570_v61 = vmax.f32 %v538_v55, 0.0  ;;  %v586_v62 = vmax.f32 %v554_v56, 0.0  ;;  %v539_v63 = vadd.f32 %v960_v47, %v500_v57  ;;  %v555_v0 = vadd.f32 %v960_v47, %v516_v58 }
 0x107   :  { %602 = vst [vmem:[%s1126_s4] sm:$0xff] %v570_v61  ;;  %618 = vst [vmem:[%s1126_s4 + $0x80] sm:$0xff] %v586_v62  ;;  %v571_v1 = vmax.f32 %v539_v63, 0.0  ;;  %v587_v2 = vmax.f32 %v555_v0, 0.0 }
 0x108   :  { %v373_v3 = vpop.f32.mrb[4].mxu0  ;;  %v437_v4 = vpop.f32.mrb[4].mxu1 }
 0x109   :  { %603 = vst [vmem:[%s1126_s4 + $0x8] sm:$0xff] %v571_v1  ;;  %619 = vst [vmem:[%s1126_s4 + $0x88] sm:$0xff] %v587_v2  ;;  %v501_v5 = vmul.f32 %v955_v45, %v373_v3  ;;  %v517_v6 = vmul.f32 %v955_v45, %v437_v4  ;;  %v375_v7 = vpop.f32.mrb[5].mxu0  ;;  %v439_v8 = vpop.f32.mrb[5].mxu1 }
 0x10a   :  { %v376_v9 = vpop.f32.mrb[6].mxu0  ;;  %v440_v10 = vpop.f32.mrb[6].mxu1 }
 0x10b   :  { %v540_v11 = vadd.f32 %v960_v47, %v501_v5  ;;  %v556_v12 = vadd.f32 %v960_v47, %v517_v6  ;;  %v502_v13 = vmul.f32 %v955_v45, %v376_v9  ;;  %v518_v14 = vmul.f32 %v955_v45, %v440_v10  ;;  %v378_v15 = vpop.f32.mrb[7].mxu0  ;;  %v442_v16 = vpop.f32.mrb[7].mxu1 }
 0x10d   :  { %v572_v17 = vmax.f32 %v540_v11, 0.0  ;;  %v588_v18 = vmax.f32 %v556_v12, 0.0  ;;  %v541_v19 = vadd.f32 %v960_v47, %v502_v13  ;;  %v557_v20 = vadd.f32 %v960_v47, %v518_v14 }
 0x10f   :  { %604 = vst [vmem:[%s1126_s4 + $0x10] sm:$0xff] %v572_v17  ;;  %620 = vst [vmem:[%s1126_s4 + $0x90] sm:$0xff] %v588_v18  ;;  %v573_v21 = vmax.f32 %v541_v19, 0.0  ;;  %v589_v22 = vmax.f32 %v557_v20, 0.0 }
 0x110   :  { %v381_v23 = vpop.f32.mrb[8].mxu0  ;;  %v445_v24 = vpop.f32.mrb[8].mxu1 }
 0x111   :  { %605 = vst [vmem:[%s1126_s4 + $0x18] sm:$0xff] %v573_v21  ;;  %621 = vst [vmem:[%s1126_s4 + $0x98] sm:$0xff] %v589_v22  ;;  %v503_v25 = vmul.f32 %v955_v45, %v381_v23  ;;  %v519_v26 = vmul.f32 %v955_v45, %v445_v24  ;;  %v383_v27 = vpop.f32.mrb[9].mxu0  ;;  %v447_v28 = vpop.f32.mrb[9].mxu1 }
 0x112   :  { %v384_v29 = vpop.f32.mrb[10].mxu0  ;;  %v448_v30 = vpop.f32.mrb[10].mxu1 }
 0x113   :  { %v542_v31 = vadd.f32 %v960_v47, %v503_v25  ;;  %v558_v32 = vadd.f32 %v960_v47, %v519_v26  ;;  %v504_v33 = vmul.f32 %v955_v45, %v384_v29  ;;  %v520_v34 = vmul.f32 %v955_v45, %v448_v30  ;;  %v386_v35 = vpop.f32.mrb[11].mxu0  ;;  %v450_v36 = vpop.f32.mrb[11].mxu1 }
 0x115   :  { %v574_v37 = vmax.f32 %v542_v31, 0.0  ;;  %v590_v38 = vmax.f32 %v558_v32, 0.0  ;;  %v543_v39 = vadd.f32 %v960_v47, %v504_v33  ;;  %v559_v40 = vadd.f32 %v960_v47, %v520_v34 }
 0x117   :  { %606 = vst [vmem:[%s1126_s4 + $0x20] sm:$0xff] %v574_v37  ;;  %622 = vst [vmem:[%s1126_s4 + $0xa0] sm:$0xff] %v590_v38  ;;  %v575_v41 = vmax.f32 %v543_v39, 0.0  ;;  %v591_v42 = vmax.f32 %v559_v40, 0.0 }
 0x118   :  { %v389_v43 = vpop.f32.mrb[12].mxu0  ;;  %v453_v44 = vpop.f32.mrb[12].mxu1 }
 0x119   :  { %607 = vst [vmem:[%s1126_s4 + $0x28] sm:$0xff] %v575_v41  ;;  %623 = vst [vmem:[%s1126_s4 + $0xa8] sm:$0xff] %v591_v42  ;;  %v505_v46 = vmul.f32 %v955_v45, %v389_v43  ;;  %v521_v48 = vmul.f32 %v955_v45, %v453_v44  ;;  %v391_v49 = vpop.f32.mrb[13].mxu0  ;;  %v455_v50 = vpop.f32.mrb[13].mxu1 }
 0x11a   :  { %v392_v51 = vpop.f32.mrb[14].mxu0  ;;  %v456_v52 = vpop.f32.mrb[14].mxu1 }
 0x11b   :  { %v544_v53 = vadd.f32 %v960_v47, %v505_v46  ;;  %v560_v54 = vadd.f32 %v960_v47, %v521_v48  ;;  %v506_v55 = vmul.f32 %v955_v45, %v392_v51  ;;  %v522_v56 = vmul.f32 %v955_v45, %v456_v52  ;;  %v394_v57 = vpop.f32.mrb[15].mxu0  ;;  %v458_v58 = vpop.f32.mrb[15].mxu1 }
 0x11d   :  { %v576_v59 = vmax.f32 %v544_v53, 0.0  ;;  %v592_v60 = vmax.f32 %v560_v54, 0.0  ;;  %v545_v61 = vadd.f32 %v960_v47, %v506_v55  ;;  %v561_v62 = vadd.f32 %v960_v47, %v522_v56 }
 0x11f   :  { %608 = vst [vmem:[%s1126_s4 + $0x30] sm:$0xff] %v576_v59  ;;  %624 = vst [vmem:[%s1126_s4 + $0xb0] sm:$0xff] %v592_v60  ;;  %v577_v63 = vmax.f32 %v545_v61, 0.0  ;;  %v593_v0 = vmax.f32 %v561_v62, 0.0 }
 0x120   :  { %v397_v1 = vpop.f32.mrb[16].mxu0  ;;  %v461_v2 = vpop.f32.mrb[16].mxu1 }
 0x121   :  { %609 = vst [vmem:[%s1126_s4 + $0x38] sm:$0xff] %v577_v63  ;;  %625 = vst [vmem:[%s1126_s4 + $0xb8] sm:$0xff] %v593_v0  ;;  %v507_v3 = vmul.f32 %v955_v45, %v397_v1  ;;  %v523_v4 = vmul.f32 %v955_v45, %v461_v2  ;;  %v399_v5 = vpop.f32.mrb[17].mxu0  ;;  %v463_v6 = vpop.f32.mrb[17].mxu1 }
 0x122   :  { %v400_v7 = vpop.f32.mrb[18].mxu0  ;;  %v464_v8 = vpop.f32.mrb[18].mxu1 }
 0x123   :  { %v546_v9 = vadd.f32 %v960_v47, %v507_v3  ;;  %v562_v10 = vadd.f32 %v960_v47, %v523_v4  ;;  %v508_v11 = vmul.f32 %v955_v45, %v400_v7  ;;  %v524_v12 = vmul.f32 %v955_v45, %v464_v8  ;;  %v402_v13 = vpop.f32.mrb[19].mxu0  ;;  %v466_v14 = vpop.f32.mrb[19].mxu1 }
 0x125   :  { %v578_v15 = vmax.f32 %v546_v9, 0.0  ;;  %v594_v16 = vmax.f32 %v562_v10, 0.0  ;;  %v547_v17 = vadd.f32 %v960_v47, %v508_v11  ;;  %v563_v18 = vadd.f32 %v960_v47, %v524_v12 }
 0x127   :  { %610 = vst [vmem:[%s1126_s4 + $0x40] sm:$0xff] %v578_v15  ;;  %626 = vst [vmem:[%s1126_s4 + $0xc0] sm:$0xff] %v594_v16  ;;  %v579_v19 = vmax.f32 %v547_v17, 0.0  ;;  %v595_v20 = vmax.f32 %v563_v18, 0.0 }
 0x128   :  { %v405_v21 = vpop.f32.mrb[20].mxu0  ;;  %v469_v22 = vpop.f32.mrb[20].mxu1 }
 0x129   :  { %611 = vst [vmem:[%s1126_s4 + $0x48] sm:$0xff] %v579_v19  ;;  %627 = vst [vmem:[%s1126_s4 + $0xc8] sm:$0xff] %v595_v20  ;;  %v509_v23 = vmul.f32 %v955_v45, %v405_v21  ;;  %v525_v24 = vmul.f32 %v955_v45, %v469_v22  ;;  %v407_v25 = vpop.f32.mrb[21].mxu0  ;;  %v471_v26 = vpop.f32.mrb[21].mxu1 }
 0x12a   :  { %v408_v27 = vpop.f32.mrb[22].mxu0  ;;  %v472_v28 = vpop.f32.mrb[22].mxu1 }
 0x12b   :  { %v548_v29 = vadd.f32 %v960_v47, %v509_v23  ;;  %v564_v30 = vadd.f32 %v960_v47, %v525_v24  ;;  %v510_v31 = vmul.f32 %v955_v45, %v408_v27  ;;  %v526_v32 = vmul.f32 %v955_v45, %v472_v28  ;;  %v410_v33 = vpop.f32.mrb[23].mxu0  ;;  %v474_v34 = vpop.f32.mrb[23].mxu1 }
 0x12d   :  { %v580_v35 = vmax.f32 %v548_v29, 0.0  ;;  %v596_v36 = vmax.f32 %v564_v30, 0.0  ;;  %v549_v37 = vadd.f32 %v960_v47, %v510_v31  ;;  %v565_v38 = vadd.f32 %v960_v47, %v526_v32 }
 0x12f   :  { %612 = vst [vmem:[%s1126_s4 + $0x50] sm:$0xff] %v580_v35  ;;  %628 = vst [vmem:[%s1126_s4 + $0xd0] sm:$0xff] %v596_v36  ;;  %v581_v39 = vmax.f32 %v549_v37, 0.0  ;;  %v597_v40 = vmax.f32 %v565_v38, 0.0 }
 0x130   :  { %v413_v41 = vpop.f32.mrb[24].mxu0  ;;  %v477_v42 = vpop.f32.mrb[24].mxu1 }
 0x131   :  { %613 = vst [vmem:[%s1126_s4 + $0x58] sm:$0xff] %v581_v39  ;;  %629 = vst [vmem:[%s1126_s4 + $0xd8] sm:$0xff] %v597_v40  ;;  %v511_v43 = vmul.f32 %v955_v45, %v413_v41  ;;  %v527_v44 = vmul.f32 %v955_v45, %v477_v42  ;;  %v415_v46 = vpop.f32.mrb[25].mxu0  ;;  %v479_v48 = vpop.f32.mrb[25].mxu1 }
 0x132   :  { %v416_v49 = vpop.f32.mrb[26].mxu0  ;;  %v480_v50 = vpop.f32.mrb[26].mxu1 }
 0x133   :  { %v550_v51 = vadd.f32 %v960_v47, %v511_v43  ;;  %v566_v52 = vadd.f32 %v960_v47, %v527_v44  ;;  %v512_v53 = vmul.f32 %v955_v45, %v416_v49  ;;  %v528_v54 = vmul.f32 %v955_v45, %v480_v50  ;;  %v418_v55 = vpop.f32.mrb[27].mxu0  ;;  %v482_v56 = vpop.f32.mrb[27].mxu1 }
 0x135   :  { %v582_v57 = vmax.f32 %v550_v51, 0.0  ;;  %v598_v58 = vmax.f32 %v566_v52, 0.0  ;;  %v551_v59 = vadd.f32 %v960_v47, %v512_v53  ;;  %v567_v60 = vadd.f32 %v960_v47, %v528_v54 }
 0x137   :  { %614 = vst [vmem:[%s1126_s4 + $0x60] sm:$0xff] %v582_v57  ;;  %630 = vst [vmem:[%s1126_s4 + $0xe0] sm:$0xff] %v598_v58  ;;  %v583_v61 = vmax.f32 %v551_v59, 0.0  ;;  %v599_v62 = vmax.f32 %v567_v60, 0.0 }
 0x138   :  { %v421_v63 = vpop.f32.mrb[28].mxu0  ;;  %v485_v0 = vpop.f32.mrb[28].mxu1 }
 0x139   :  { %615 = vst [vmem:[%s1126_s4 + $0x68] sm:$0xff] %v583_v61  ;;  %631 = vst [vmem:[%s1126_s4 + $0xe8] sm:$0xff] %v599_v62  ;;  %v513_v1 = vmul.f32 %v955_v45, %v421_v63  ;;  %v529_v2 = vmul.f32 %v955_v45, %v485_v0  ;;  %v423_v3 = vpop.f32.mrb[29].mxu0  ;;  %v487_v4 = vpop.f32.mrb[29].mxu1 }
 0x13a   :  { %v424_v5 = vpop.f32.mrb[30].mxu0  ;;  %v488_v6 = vpop.f32.mrb[30].mxu1 }
 0x13b   :  { %v552_v7 = vadd.f32 %v960_v47, %v513_v1  ;;  %v568_v8 = vadd.f32 %v960_v47, %v529_v2  ;;  %v514_v9 = vmul.f32 %v955_v45, %v424_v5  ;;  %v530_v10 = vmul.f32 %v955_v45, %v488_v6  ;;  %v426_v11 = vpop.f32.mrb[31].mxu0  ;;  %v490_v12 = vpop.f32.mrb[31].mxu1 }
 0x13d   :  { %v584_v13 = vmax.f32 %v552_v7, 0.0  ;;  %v600_v14 = vmax.f32 %v568_v8, 0.0  ;;  %v553_v15 = vadd.f32 %v960_v47, %v514_v9  ;;  %v569_v16 = vadd.f32 %v960_v47, %v530_v10 }
 0x13f   :  { %616 = vst [vmem:[%s1126_s4 + $0x70] sm:$0xff] %v584_v13  ;;  %632 = vst [vmem:[%s1126_s4 + $0xf0] sm:$0xff] %v600_v14  ;;  %v585_v17 = vmax.f32 %v553_v15, 0.0  ;;  %v601_v18 = vmax.f32 %v569_v16, 0.0 }
 0x141   :  { %617 = vst [vmem:[%s1126_s4 + $0x78] sm:$0xff] %v585_v17  ;;  %633 = vst [vmem:[%s1126_s4 + $0xf8] sm:$0x3] %v601_v18 }

// kernel: ssrn_forward.15
= control target key start
LH: loop header
LB: loop body
LE: loop exit
PB: predicated region body
PF: predicated region fallthrough
CT: control target
= control target key end

     0   :  { %vm103_vm0 = vcmask 982016   ;;  %vm116_vm1 = vcmask 1043456   ;;  %s399_s1 = inlined_call_operand.vmem [shape: bf16[120,128], index: 1, kind: input, shape index: {}]   ;;  %s400_s0 = inlined_call_operand.vmem [shape: bf16[50,120], index: 0, kind: input, shape index: {}]   ;;  %s401_s2 = inlined_call_operand.vmem [shape: f32[1,128], index: 2, kind: input, shape index: {}]   ;;  %s402_s3 = inlined_call_operand.vmem [shape: f32[1,128], index: 3, kind: input, shape index: {}]   ;;  %s403_s4 = inlined_call_operand.vmem [shape: f32[50,128], index: 4, kind: output, shape index: {}]  }
   0x1   :  { %v295_v0 = vld [vmem:[%s399_s1] sm:$0xff]   ;;  %v296_v1 = vld [vmem:[%s399_s1 + $0x8] sm:$0xff]   ;;  %v297_v2 = vld [vmem:[%s399_s1 + $0x10] sm:$0xff]  }
   0x2   :  { %253 = vmatprep.subr.bf16.mxu0 %v295_v0  ;;  %277 = vmatprep.subr.bf16.mxu1 %v295_v0  ;;  %v298_v3 = vld [vmem:[%s399_s1 + $0x18] sm:$0xff]   ;;  %v303_v4 = vld [vmem:[%s400_s0] sm:$0xff]   ;;  %v304_v5 = vld [vmem:[%s400_s0 + $0x10] sm:$0xff]  }
   0x3   :  { %254 = vmatpush3.bf16.msra.mxu0 %v295_v0  ;;  %285 = vmatpush3.bf16.msra.mxu1 %v295_v0  ;;  %v299_v6 = vld [vmem:[%s399_s1 + $0x20] sm:$0xff]   ;;  %v300_v7 = vld [vmem:[%s399_s1 + $0x28] sm:$0xff]   ;;  %v301_v8 = vld [vmem:[%s399_s1 + $0x30] sm:$0xff]  }
   0x4   :  { %255 = vmatprep.subr.bf16.mxu0 %v296_v1  ;;  %278 = vmatprep.subr.bf16.mxu1 %v296_v1  ;;  %v302_v9 = vld [vmem:[%s399_s1 + $0x38] ss:$0 sps:$4 sm:$0xff]   ;;  %v305_v11 = vld [vmem:[%s400_s0 + $0x8] sm:$0xff]   ;;  %v239_v13 = vld [vmem:[%s401_s2] ss:$0 sm:$0xff] }
   0x5   :  { %269 = vmatprep.mubr.msk.bf16.mxu0 %vm103_vm0, %v303_v4  ;;  %273 = vmatprep.mubr.msk.bf16.mxu1 %vm103_vm0, %v304_v5  ;;  %v118_v10 = vsel %vm116_vm1, %v302_v9, 0  ;;  %v306_v12 = vld [vmem:[%s400_s0 + $0x18] ss:$0 sps:$4 sm:$0x11]   ;;  %v240_v15 = vld [vmem:[%s402_s3] ss:$0 sm:$0xff] }
   0x7   :  { %256 = vmatpush3.bf16.msra.mxu0 %v296_v1  ;;  %286 = vmatpush3.bf16.msra.mxu1 %v296_v1 }
   0x8   :  { %257 = vmatprep.subr.bf16.mxu0 %v297_v2  ;;  %279 = vmatprep.subr.bf16.mxu1 %v297_v2 }
   0xb   :  { %258 = vmatpush3.bf16.msra.mxu0 %v297_v2  ;;  %287 = vmatpush3.bf16.msra.mxu1 %v297_v2 }
   0xc   :  { %259 = vmatprep.subr.bf16.mxu0 %v298_v3  ;;  %280 = vmatprep.subr.bf16.mxu1 %v298_v3 }
   0xf   :  { %260 = vmatpush3.bf16.msra.mxu0 %v298_v3  ;;  %288 = vmatpush3.bf16.msra.mxu1 %v298_v3 }
  0x10   :  { %261 = vmatprep.subr.bf16.mxu0 %v299_v6  ;;  %281 = vmatprep.subr.bf16.mxu1 %v299_v6 }
  0x13   :  { %262 = vmatpush3.bf16.msra.mxu0 %v299_v6  ;;  %289 = vmatpush3.bf16.msra.mxu1 %v299_v6 }
  0x14   :  { %263 = vmatprep.subr.bf16.mxu0 %v300_v7  ;;  %282 = vmatprep.subr.bf16.mxu1 %v300_v7 }
  0x17   :  { %264 = vmatpush3.bf16.msra.mxu0 %v300_v7  ;;  %290 = vmatpush3.bf16.msra.mxu1 %v300_v7 }
  0x18   :  { %265 = vmatprep.subr.bf16.mxu0 %v301_v8  ;;  %283 = vmatprep.subr.bf16.mxu1 %v301_v8 }
  0x1b   :  { %266 = vmatpush3.bf16.msra.mxu0 %v301_v8  ;;  %291 = vmatpush3.bf16.msra.mxu1 %v301_v8 }
  0x1c   :  { %293 = vmatprep.subr.msk.bf16.mxu0 %vm116_vm1, %v302_v9  ;;  %294 = vmatprep.subr.msk.bf16.mxu1 %vm116_vm1, %v302_v9 }
  0x1f   :  { %268 = vmatpush3.bf16.msra.mxu0 %v118_v10  ;;  %292 = vmatpush3.bf16.msra.mxu1 %v118_v10 }
  0x22   :  { %270 = vmatmul.mubr.msk.bf16.vlgmr.msra.gmra.mrb[0].mxu0 %vm103_vm0, %v305_v11  ;;  %274 = vmatmul.mubr.msk.bf16.vlgmr.msra.gmra.mrb[0].mxu1 %vm103_vm0, %v306_v12 }
  0xf5   :  { %v271_v14 = vpop.f32.mrb[0].mxu0  ;;  %v275_v16 = vpop.f32.mrb[0].mxu1 }
  0xf6   :  { %v193_v17 = vmul.f32 %v271_v14, %v239_v13  ;;  %v197_v18 = vmul.f32 %v275_v16, %v239_v13  ;;  %v154_v19 = vpop.f32.mrb[1].mxu0  ;;  %v170_v20 = vpop.f32.mrb[1].mxu1 }
  0xf7   :  { %v191_v21 = vmul.f32 %v239_v13, %v154_v19  ;;  %v195_v22 = vmul.f32 %v239_v13, %v170_v20  ;;  %v272_v23 = vpop.f32.mrb[2].mxu0  ;;  %v276_v24 = vpop.f32.mrb[2].mxu1 }
  0xf8   :  { %v207_v25 = vadd.f32 %v240_v15, %v193_v17  ;;  %v211_v26 = vadd.f32 %v240_v15, %v197_v18  ;;  %v194_v27 = vmul.f32 %v272_v23, %v239_v13  ;;  %v157_v28 = vpop.f32.mrb[3].mxu0  ;;  %v173_v29 = vpop.f32.mrb[3].mxu1 }
  0xf9   :  { %v205_v30 = vadd.f32 %v240_v15, %v191_v21  ;;  %v209_v31 = vadd.f32 %v240_v15, %v195_v22  ;;  %v192_v32 = vmul.f32 %v239_v13, %v157_v28  ;;  %v196_v33 = vmul.f32 %v239_v13, %v173_v29 }
  0xfa   :  { %214 = vst [vmem:[%s403_s4 + $0x10] sm:$0xff] %v207_v25  ;;  %218 = vst [vmem:[%s403_s4 + $0x30] sm:$0x3] %v211_v26  ;;  %v208_v34 = vadd.f32 %v240_v15, %v194_v27 }
  0xfb   :  { %212 = vst [vmem:[%s403_s4] sm:$0xff] %v205_v30  ;;  %216 = vst [vmem:[%s403_s4 + $0x20] sm:$0xff] %v209_v31  ;;  %v206_v35 = vadd.f32 %v240_v15, %v192_v32  ;;  %v210_v36 = vadd.f32 %v240_v15, %v196_v33 }
  0xfc   :  { %215 = vst [vmem:[%s403_s4 + $0x18] sm:$0xff] %v208_v34 }
  0xfd   :  { %213 = vst [vmem:[%s403_s4 + $0x8] sm:$0xff] %v206_v35  ;;  %217 = vst [vmem:[%s403_s4 + $0x28] sm:$0xff] %v210_v36 }

// kernel: ssrn_forward.16
= control target key start
LH: loop header
LB: loop body
LE: loop exit
PB: predicated region body
PF: predicated region fallthrough
CT: control target
= control target key end

     0   :  { %s1580_s1 = inlined_call_operand.vmem [shape: bf16[1152,128], index: 1, kind: input, shape index: {}]   ;;  %s1581_s0 = inlined_call_operand.vmem [shape: bf16[18,1152], index: 0, kind: input, shape index: {}]   ;;  %s1582_s2 = inlined_call_operand.vmem [shape: f32[1,128], index: 2, kind: input, shape index: {}]   ;;  %s1583_s3 = inlined_call_operand.vmem [shape: f32[1,128], index: 3, kind: input, shape index: {}]   ;;  %s1584_s4 = inlined_call_operand.vmem [shape: f32[18,128], index: 4, kind: output, shape index: {}]  }
   0x1   :  { %v1188_v0 = vld [vmem:[%s1580_s1 + $0x40] sm:$0xff]   ;;  %v1192_v4 = vld [vmem:[%s1580_s1 + $0x48] sm:$0xff]   ;;  %v1196_v8 = vld [vmem:[%s1580_s1 + $0x50] sm:$0xff]  }
   0x2   :  { %v1189_v1 = vld [vmem:[%s1580_s1 + $0xc0] sm:$0xff]   ;;  %1046 = vmatprep.subr.bf16.mxu0 %v1188_v0  ;;  %v1193_v5 = vld [vmem:[%s1580_s1 + $0xc8] sm:$0xff]   ;;  %v1197_v9 = vld [vmem:[%s1580_s1 + $0xd0] sm:$0xff]  }
   0x3   :  { %v1190_v2 = vld [vmem:[%s1580_s1] sm:$0xff]   ;;  %1074 = vmatprep.subr.bf16.mxu1 %v1189_v1  ;;  %v1194_v6 = vld [vmem:[%s1580_s1 + $0x8] sm:$0xff]   ;;  %v1198_v10 = vld [vmem:[%s1580_s1 + $0x10] sm:$0xff]  }
   0x4   :  { %v1191_v3 = vld [vmem:[%s1580_s1 + $0x80] sm:$0xff]   ;;  %1047 = vmatpush3.bf16.msra.mxu0 %v1190_v2  ;;  %v1195_v7 = vld [vmem:[%s1580_s1 + $0x88] sm:$0xff]   ;;  %v1199_v11 = vld [vmem:[%s1580_s1 + $0x90] sm:$0xff]  }
   0x5   :  { %1075 = vmatpush3.bf16.msra.mxu1 %v1191_v3  ;;  %1048 = vmatprep.subr.bf16.mxu0 %v1192_v4  ;;  %v1200_v12 = vld [vmem:[%s1580_s1 + $0x58] sm:$0xff]   ;;  %v1204_v16 = vld [vmem:[%s1580_s1 + $0x60] sm:$0xff]   ;;  %v1208_v20 = vld [vmem:[%s1580_s1 + $0x68] sm:$0xff]  }
   0x6   :  { %1076 = vmatprep.subr.bf16.mxu1 %v1193_v5  ;;  %v1201_v13 = vld [vmem:[%s1580_s1 + $0xd8] sm:$0xff]   ;;  %v1205_v17 = vld [vmem:[%s1580_s1 + $0xe0] sm:$0xff]   ;;  %v1209_v21 = vld [vmem:[%s1580_s1 + $0xe8] sm:$0xff]  }
   0x7   :  { %v1202_v14 = vld [vmem:[%s1580_s1 + $0x18] sm:$0xff]   ;;  %v1206_v18 = vld [vmem:[%s1580_s1 + $0x20] sm:$0xff]   ;;  %v1210_v22 = vld [vmem:[%s1580_s1 + $0x28] sm:$0xff]  }
   0x8   :  { %1049 = vmatpush3.bf16.msra.mxu0 %v1194_v6  ;;  %v1203_v15 = vld [vmem:[%s1580_s1 + $0x98] sm:$0xff]   ;;  %v1207_v19 = vld [vmem:[%s1580_s1 + $0xa0] sm:$0xff]   ;;  %v1211_v23 = vld [vmem:[%s1580_s1 + $0xa8] sm:$0xff]  }
   0x9   :  { %1077 = vmatpush3.bf16.msra.mxu1 %v1195_v7  ;;  %1050 = vmatprep.subr.bf16.mxu0 %v1196_v8  ;;  %v1212_v24 = vld [vmem:[%s1580_s1 + $0x70] sm:$0xff]   ;;  %v1216_v28 = vld [vmem:[%s1580_s1 + $0x78] sm:$0xff]   ;;  %v1220_v32 = vld [vmem:[%s1581_s0] ss:$36 sps:$4 sm:$0xff]  }
   0xa   :  { %1078 = vmatprep.subr.bf16.mxu1 %v1197_v9  ;;  %v1213_v25 = vld [vmem:[%s1580_s1 + $0xf0] sm:$0xff]   ;;  %v1217_v29 = vld [vmem:[%s1580_s1 + $0xf8] sm:$0xff]   ;;  %v1222_v33 = vld [vmem:[%s1581_s0 + $0x4] ss:$36 sps:$4 sm:$0xff]  }
   0xb   :  { %v1214_v26 = vld [vmem:[%s1580_s1 + $0x30] sm:$0xff]   ;;  %v1218_v30 = vld [vmem:[%s1580_s1 + $0x38] sm:$0xff]   ;;  %v1223_v34 = vld [vmem:[%s1581_s0 + $0x8] ss:$36 sps:$4 sm:$0xff]   ;;  %719 = vmatprep.mubr.bf16.mxu0 %v1222_v33 }
   0xc   :  { %1051 = vmatpush3.bf16.msra.mxu0 %v1198_v10  ;;  %v1215_v27 = vld [vmem:[%s1580_s1 + $0xb0] sm:$0xff]   ;;  %v1219_v31 = vld [vmem:[%s1580_s1 + $0xb8] sm:$0xff]   ;;  %v1226_v36 = vld [vmem:[%s1580_s1 + $0x140] sm:$0xff]  }
   0xd   :  { %1079 = vmatpush3.bf16.msra.mxu1 %v1199_v11  ;;  %1052 = vmatprep.subr.bf16.mxu0 %v1200_v12  ;;  %v1225_v35 = vld [vmem:[%s1581_s0 + $0xc] ss:$36 sps:$4 sm:$0xff]   ;;  %v1227_v37 = vld [vmem:[%s1580_s1 + $0x100] sm:$0xff]   ;;  %v1238_v48 = vld [vmem:[%s1580_s1 + $0x158] sm:$0xff]  }
   0xe   :  { %1080 = vmatprep.subr.bf16.mxu1 %v1201_v13  ;;  %767 = vmatprep.mubr.bf16.mxu1 %v1225_v35  ;;  %v1228_v38 = vld [vmem:[%s1580_s1 + $0x1c0] sm:$0xff]   ;;  %v1230_v40 = vld [vmem:[%s1580_s1 + $0x148] sm:$0xff]   ;;  %v1234_v44 = vld [vmem:[%s1580_s1 + $0x150] sm:$0xff]  }
   0xf   :  { %v1229_v39 = vld [vmem:[%s1580_s1 + $0x180] sm:$0xff]   ;;  %v1231_v41 = vld [vmem:[%s1580_s1 + $0x108] sm:$0xff]   ;;  %v1235_v45 = vld [vmem:[%s1580_s1 + $0x110] sm:$0xff]  }
  0x10   :  { %1053 = vmatpush3.bf16.msra.mxu0 %v1202_v14  ;;  %v1232_v42 = vld [vmem:[%s1580_s1 + $0x1c8] sm:$0xff]   ;;  %v1236_v46 = vld [vmem:[%s1580_s1 + $0x1d0] sm:$0xff]   ;;  %v1239_v49 = vld [vmem:[%s1580_s1 + $0x118] sm:$0xff]  }
  0x11   :  { %1081 = vmatpush3.bf16.msra.mxu1 %v1203_v15  ;;  %1054 = vmatprep.subr.bf16.mxu0 %v1204_v16  ;;  %v1233_v43 = vld [vmem:[%s1580_s1 + $0x188] sm:$0xff]   ;;  %v1237_v47 = vld [vmem:[%s1580_s1 + $0x190] sm:$0xff]   ;;  %v1240_v50 = vld [vmem:[%s1580_s1 + $0x1d8] sm:$0xff]  }
  0x12   :  { %1082 = vmatprep.subr.bf16.mxu1 %v1205_v17  ;;  %v1241_v51 = vld [vmem:[%s1580_s1 + $0x198] sm:$0xff]   ;;  %v1242_v52 = vld [vmem:[%s1580_s1 + $0x160] sm:$0xff]   ;;  %v1246_v56 = vld [vmem:[%s1580_s1 + $0x168] sm:$0xff]  }
  0x13   :  { %v1243_v53 = vld [vmem:[%s1580_s1 + $0x120] sm:$0xff]   ;;  %v28_v57 = vld [vmem:[%s1581_s0 + $0x48] sm:$0x11]  ;;  %v29_v62 = vld [vmem:[%s1581_s0 + $0x50] sm:$0x11] }
  0x14   :  { %1055 = vmatpush3.bf16.msra.mxu0 %v1206_v18  ;;  %v1244_v54 = vld [vmem:[%s1580_s1 + $0x1e0] sm:$0xff]   ;;  %v964_v58 = vcombine.high %v28_v57, %v28_v57  ;;  %v1248_v59 = vld [vmem:[%s1580_s1 + $0x128] sm:$0xff]   ;;  %v963_v60 = vcombine.low %v28_v57, %v28_v57  ;;  %v966_v63 = vcombine.high %v29_v62, %v29_v62  ;;  %v965_v1 = vcombine.low %v29_v62, %v29_v62  ;;  %v1254_v2 = vld [vmem:[%s1580_s1 + $0x170] sm:$0xff]  }
  0x15   :  { %1083 = vmatpush3.bf16.msra.mxu1 %v1207_v19  ;;  %1056 = vmatprep.subr.bf16.mxu0 %v1208_v20  ;;  %v1245_v55 = vld [vmem:[%s1580_s1 + $0x1a0] sm:$0xff]   ;;  %v1250_v61 = vld [vmem:[%s1580_s1 + $0x1e8] sm:$0xff]   ;;  %v1255_v3 = vld [vmem:[%s1580_s1 + $0x130] sm:$0xff]  }
  0x16   :  { %1084 = vmatprep.subr.bf16.mxu1 %v1209_v21  ;;  %v1252_v0 = vld [vmem:[%s1580_s1 + $0x1a8] sm:$0xff]   ;;  %v1256_v4 = vld [vmem:[%s1580_s1 + $0x1f0] sm:$0xff]   ;;  %v1258_v6 = vld [vmem:[%s1580_s1 + $0x178] sm:$0xff]  }
  0x17   :  { %v1257_v5 = vld [vmem:[%s1580_s1 + $0x1b0] sm:$0xff]   ;;  %v1259_v7 = vld [vmem:[%s1580_s1 + $0x138] sm:$0xff]   ;;  %v1265_v12 = vld [vmem:[%s1580_s1 + $0x200] sm:$0xff]  }
  0x18   :  { %1057 = vmatpush3.bf16.msra.mxu0 %v1210_v22  ;;  %v1260_v8 = vld [vmem:[%s1580_s1 + $0x1f8] sm:$0xff]   ;;  %v1261_v9 = vld [vmem:[%s1581_s0 + $0x10] ss:$36 sps:$4 sm:$0xff]   ;;  %v1269_v15 = vld [vmem:[%s1580_s1 + $0x208] sm:$0xff]  }
  0x19   :  { %1085 = vmatpush3.bf16.msra.mxu1 %v1211_v23  ;;  %1058 = vmatprep.subr.bf16.mxu0 %v1212_v24  ;;  %v1263_v10 = vld [vmem:[%s1581_s0 + $0x14] ss:$36 sps:$4 sm:$0xff]   ;;  %v1268_v14 = vld [vmem:[%s1581_s0 + $0x1c] ss:$36 sps:$4 sm:$0xff]  }
  0x1a   :  { %1086 = vmatprep.subr.bf16.mxu1 %v1213_v25  ;;  %v1264_v11 = vld [vmem:[%s1580_s1 + $0x1b8] sm:$0xff]   ;;  %v1272_v18 = vld [vmem:[%s1580_s1 + $0x210] sm:$0xff]   ;;  %v31_v19 = vld [vmem:[%s1581_s0 + $0x60] sm:$0x11] }
  0x1b   :  { %v1266_v13 = vld [vmem:[%s1581_s0 + $0x18] ss:$36 sps:$4 sm:$0xff]   ;;  %v970_v21 = vcombine.high %v31_v19, %v31_v19  ;;  %v969_v22 = vcombine.low %v31_v19, %v31_v19  ;;  %v1280_v24 = vld [vmem:[%s1581_s0 + $0x20] ss:$36 sps:$4 sm:$0xff]  }
  0x1c   :  { %1059 = vmatpush3.bf16.msra.mxu0 %v1214_v26  ;;  %v30_v16 = vld [vmem:[%s1581_s0 + $0x58] sm:$0x11]  ;;  %v1276_v25 = vld [vmem:[%s1580_s1 + $0x220] sm:$0xff]   ;;  %v1277_v26 = vld [vmem:[%s1580_s1 + $0x228] sm:$0xff]  }
  0x1d   :  { %1087 = vmatpush3.bf16.msra.mxu1 %v1215_v27  ;;  %1060 = vmatprep.subr.bf16.mxu0 %v1216_v28  ;;  %v968_v17 = vcombine.high %v30_v16, %v30_v16  ;;  %v967_v20 = vcombine.low %v30_v16, %v30_v16  ;;  %v1275_v23 = vld [vmem:[%s1580_s1 + $0x218] sm:$0xff]   ;;  %v1278_v27 = vld [vmem:[%s1580_s1 + $0x230] sm:$0xff]  }
  0x1e   :  { %1088 = vmatprep.subr.bf16.mxu1 %v1217_v29  ;;  %v1279_v28 = vld [vmem:[%s1580_s1 + $0x238] sm:$0xff]   ;;  %v1281_v29 = vld [vmem:[%s1581_s0 + $0x68] ss:$0 sps:$4 sm:$0x11]  }
  0x20   :  { %1061 = vmatpush3.bf16.msra.mxu0 %v1218_v30 }
  0x21   :  { %1089 = vmatpush3.bf16.msra.mxu1 %v1219_v31  ;;  %1102 = vmatprep.subr.bf16.mxu0 %v1226_v36 }
  0x22   :  { %1130 = vmatprep.subr.bf16.mxu1 %v1228_v38 }
  0x23   :  { %720 = vmatmul.mubr.bf16.vlgmr.msra.gmra.mrb[0].mxu0 %v1220_v32 }
  0x24   :  { %768 = vmatmul.mubr.bf16.vlgmr.msra.gmra.mrb[0].mxu1 %v1223_v34  ;;  %1103 = vmatpush3.bf16.msra.mxu0 %v1227_v37 }
  0x25   :  { %1131 = vmatpush3.bf16.msra.mxu1 %v1229_v39  ;;  %1104 = vmatprep.subr.bf16.mxu0 %v1230_v40 }
  0x26   :  { %1132 = vmatprep.subr.bf16.mxu1 %v1232_v42  ;;  %727 = vmatprep.mubr.bf16.mxu0 %v964_v58 }
  0x27   :  { %775 = vmatprep.mubr.bf16.mxu1 %v966_v63 }
  0x28   :  { %1105 = vmatpush3.bf16.msra.mxu0 %v1231_v41 }
  0x29   :  { %1133 = vmatpush3.bf16.msra.mxu1 %v1233_v43  ;;  %1106 = vmatprep.subr.bf16.mxu0 %v1234_v44 }
  0x2a   :  { %1134 = vmatprep.subr.bf16.mxu1 %v1236_v46 }
  0x2b   :  { %728 = vmatmul.mubr.bf16.gmra.mrb[4].mxu0 %v963_v60 }
  0x2c   :  { %1107 = vmatpush3.bf16.msra.mxu0 %v1235_v45  ;;  %776 = vmatmul.mubr.bf16.gmra.mrb[4].mxu1 %v965_v1 }
  0x2d   :  { %1135 = vmatpush3.bf16.msra.mxu1 %v1237_v47  ;;  %1108 = vmatprep.subr.bf16.mxu0 %v1238_v48 }
  0x2e   :  { %1136 = vmatprep.subr.bf16.mxu1 %v1240_v50  ;;  %815 = vmatprep.mubr.bf16.mxu0 %v1263_v10 }
  0x2f   :  { %863 = vmatprep.mubr.bf16.mxu1 %v1268_v14 }
  0x30   :  { %1109 = vmatpush3.bf16.msra.mxu0 %v1239_v49 }
  0x31   :  { %1137 = vmatpush3.bf16.msra.mxu1 %v1241_v51  ;;  %1110 = vmatprep.subr.bf16.mxu0 %v1242_v52 }
  0x32   :  { %1138 = vmatprep.subr.bf16.mxu1 %v1244_v54 }
  0x34   :  { %1111 = vmatpush3.bf16.msra.mxu0 %v1243_v53 }
  0x35   :  { %1139 = vmatpush3.bf16.msra.mxu1 %v1245_v55  ;;  %1112 = vmatprep.subr.bf16.mxu0 %v1246_v56 }
  0x36   :  { %1140 = vmatprep.subr.bf16.mxu1 %v1250_v61 }
  0x38   :  { %1113 = vmatpush3.bf16.msra.mxu0 %v1248_v59 }
  0x39   :  { %1141 = vmatpush3.bf16.msra.mxu1 %v1252_v0  ;;  %1114 = vmatprep.subr.bf16.mxu0 %v1254_v2 }
  0x3a   :  { %1142 = vmatprep.subr.bf16.mxu1 %v1256_v4 }
  0x3c   :  { %1115 = vmatpush3.bf16.msra.mxu0 %v1255_v3 }
  0x3d   :  { %1143 = vmatpush3.bf16.msra.mxu1 %v1257_v5  ;;  %1116 = vmatprep.subr.bf16.mxu0 %v1258_v6 }
  0x3e   :  { %1144 = vmatprep.subr.bf16.mxu1 %v1260_v8 }
  0x40   :  { %1117 = vmatpush3.bf16.msra.mxu0 %v1259_v7 }
  0x41   :  { %1145 = vmatpush3.bf16.msra.mxu1 %v1264_v11  ;;  %1168 = vmatprep.subr.bf16.mxu0 %v1265_v12 }
  0x43   :  { %816 = vmatmul.mubr.bf16.vlgmr.msra.gmra.mrb[8].mxu0 %v1261_v9 }
  0x44   :  { %1169 = vmatpush3.bf16.msra.mxu0 %v1265_v12  ;;  %864 = vmatmul.mubr.bf16.vlgmr.msra.gmra.mrb[8].mxu1 %v1266_v13 }
  0x45   :  { %1170 = vmatprep.subr.bf16.mxu0 %v1269_v15  ;;  %823 = vmatprep.mubr.bf16.mxu0 %v968_v17 }
  0x46   :  { %871 = vmatprep.mubr.bf16.mxu1 %v970_v21 }
  0x48   :  { %1171 = vmatpush3.bf16.msra.mxu0 %v1269_v15 }
  0x49   :  { %1172 = vmatprep.subr.bf16.mxu0 %v1272_v18 }
  0x4b   :  { %824 = vmatmul.mubr.bf16.gmra.mrb[12].mxu0 %v967_v20  ;;  %v1044_v20 = vld [vmem:[%s1582_s2] ss:$0 sm:$0xff] }
  0x4c   :  { %1173 = vmatpush3.bf16.msra.mxu0 %v1272_v18  ;;  %872 = vmatmul.mubr.bf16.gmra.mrb[12].mxu1 %v969_v22 }
  0x4d   :  { %1174 = vmatprep.subr.bf16.mxu0 %v1275_v23  ;;  %1184 = vmatprep.mubr.bf16.mxu0 %v1280_v24 }
  0x50   :  { %1175 = vmatpush3.bf16.msra.mxu0 %v1275_v23  ;;  %v1045_v23 = vld [vmem:[%s1583_s3] ss:$0 sm:$0xff] }
  0x51   :  { %1176 = vmatprep.subr.bf16.mxu0 %v1276_v25 }
  0x54   :  { %1177 = vmatpush3.bf16.msra.mxu0 %v1276_v25 }
  0x55   :  { %1178 = vmatprep.subr.bf16.mxu0 %v1277_v26 }
  0x58   :  { %1179 = vmatpush3.bf16.msra.mxu0 %v1277_v26 }
  0x59   :  { %1180 = vmatprep.subr.bf16.mxu0 %v1278_v27 }
  0x5c   :  { %1181 = vmatpush3.bf16.msra.mxu0 %v1278_v27 }
  0x5d   :  { %1182 = vmatprep.subr.bf16.mxu0 %v1279_v28 }
  0x60   :  { %1183 = vmatpush3.bf16.msra.mxu0 %v1279_v28 }
  0x63   :  { %1185 = vmatmul.mubr.bf16.vlgmr.msra.gmra.mrb[16].mxu0 %v1281_v29 }
  0xf6   :  { %v1062_v30 = vpop.f32.mrb[0].mxu0 }
  0xf7   :  { %v1090_v31 = vpop.f32.mrb[0].mxu1  ;;  %v1063_v32 = vpop.f32.mrb[1].mxu0 }
  0xf8   :  { %v1064_v33 = vadd.f32 %v1063_v32, %v1062_v30  ;;  %v1091_v34 = vpop.f32.mrb[1].mxu1  ;;  %v1065_v35 = vpop.f32.mrb[2].mxu0 }
  0xf9   :  { %v1092_v36 = vadd.f32 %v1091_v34, %v1090_v31  ;;  %v1093_v37 = vpop.f32.mrb[2].mxu1  ;;  %v1066_v38 = vpop.f32.mrb[3].mxu0 }
  0xfa   :  { %v1067_v39 = vadd.f32 %v1066_v38, %v1065_v35  ;;  %v1094_v40 = vpop.f32.mrb[3].mxu1 }
  0xfb   :  { %v770_v41 = vadd.f32 %v1092_v36, %v1064_v33  ;;  %v1095_v42 = vadd.f32 %v1094_v40, %v1093_v37 }
  0xfd   :  { %v773_v43 = vadd.f32 %v1095_v42, %v1067_v39 }
  0xfe   :  { %v1068_v44 = vpop.f32.mrb[4].mxu0 }
  0xff   :  { %v1069_v45 = vpop.f32.mrb[5].mxu0  ;;  %v1096_v48 = vpop.f32.mrb[4].mxu1 }
 0x100   :  { %v1070_v46 = vadd.f32 %v1069_v45, %v1068_v44  ;;  %v1071_v47 = vpop.f32.mrb[6].mxu0  ;;  %v1097_v50 = vpop.f32.mrb[5].mxu1 }
 0x101   :  { %v1072_v49 = vpop.f32.mrb[7].mxu0  ;;  %v1098_v51 = vadd.f32 %v1097_v50, %v1096_v48  ;;  %v1099_v52 = vpop.f32.mrb[6].mxu1 }
 0x102   :  { %v1100_v53 = vpop.f32.mrb[7].mxu1 }
 0x103   :  { %v778_v54 = vadd.f32 %v1098_v51, %v1070_v46 }
 0x116   :  { %v1118_v55 = vpop.f32.mrb[8].mxu0 }
 0x117   :  { %v1119_v56 = vpop.f32.mrb[9].mxu0  ;;  %v1146_v59 = vpop.f32.mrb[8].mxu1 }
 0x118   :  { %v1120_v57 = vadd.f32 %v1119_v56, %v1118_v55  ;;  %v1121_v58 = vpop.f32.mrb[10].mxu0  ;;  %v1147_v63 = vpop.f32.mrb[9].mxu1 }
 0x119   :  { %v1122_v60 = vpop.f32.mrb[11].mxu0  ;;  %v1148_v0 = vadd.f32 %v1147_v63, %v1146_v59  ;;  %v1149_v1 = vpop.f32.mrb[10].mxu1 }
 0x11a   :  { %v818_v61 = vadd.f32 %v1120_v57, %v770_v41  ;;  %v1123_v62 = vadd.f32 %v1122_v60, %v1121_v58  ;;  %v1150_v3 = vpop.f32.mrb[11].mxu1 }
 0x11b   :  { %v1151_v4 = vadd.f32 %v1150_v3, %v1149_v1 }
 0x11c   :  { %v821_v2 = vadd.f32 %v1123_v62, %v773_v43  ;;  %v866_v5 = vadd.f32 %v1148_v0, %v818_v61 }
 0x11e   :  { %v1124_v6 = vpop.f32.mrb[12].mxu0  ;;  %v869_v8 = vadd.f32 %v1151_v4, %v821_v2 }
 0x11f   :  { %v1125_v7 = vpop.f32.mrb[13].mxu0  ;;  %v1152_v11 = vpop.f32.mrb[12].mxu1 }
 0x120   :  { %v1126_v9 = vadd.f32 %v1125_v7, %v1124_v6  ;;  %v1127_v10 = vpop.f32.mrb[14].mxu0  ;;  %v1153_v14 = vpop.f32.mrb[13].mxu1 }
 0x121   :  { %v1128_v12 = vpop.f32.mrb[15].mxu0  ;;  %v1154_v15 = vadd.f32 %v1153_v14, %v1152_v11  ;;  %v1155_v16 = vpop.f32.mrb[14].mxu1 }
 0x122   :  { %v826_v13 = vadd.f32 %v1126_v9, %v778_v54  ;;  %v1156_v17 = vpop.f32.mrb[15].mxu1 }
 0x124   :  { %v874_v18 = vadd.f32 %v1154_v15, %v826_v13 }
 0x136   :  { %v1186_v19 = vpop.f32.mrb[16].mxu0 }
 0x137   :  { %v922_v21 = vadd.f32 %v1186_v19, %v874_v18  ;;  %v913_v22 = vpop.f32.mrb[17].mxu0 }
 0x138   :  { %v914_v24 = vadd.f32 %v913_v22, %v866_v5  ;;  %v1187_v25 = vpop.f32.mrb[18].mxu0 }
 0x139   :  { %v936_v26 = vmul.f32 %v1044_v20, %v922_v21  ;;  %v916_v27 = vpop.f32.mrb[19].mxu0 }
 0x13a   :  { %v934_v28 = vmul.f32 %v1044_v20, %v914_v24  ;;  %v917_v29 = vadd.f32 %v916_v27, %v869_v8 }
 0x13b   :  { %v946_v30 = vadd.f32 %v1045_v23, %v936_v26 }
 0x13c   :  { %v944_v31 = vadd.f32 %v1045_v23, %v934_v28  ;;  %v935_v32 = vmul.f32 %v1044_v20, %v917_v29 }
 0x13d   :  { %949 = vst [vmem:[%s1584_s4 + $0x10] sm:$0x3] %v946_v30 }
 0x13e   :  { %947 = vst [vmem:[%s1584_s4] sm:$0xff] %v944_v31  ;;  %v945_v33 = vadd.f32 %v1045_v23, %v935_v32 }
 0x140   :  { %948 = vst [vmem:[%s1584_s4 + $0x8] sm:$0xff] %v945_v33 }

// kernel: ssrn_forward.17
= control target key start
LH: loop header
LB: loop body
LE: loop exit
PB: predicated region body
PF: predicated region fallthrough
CT: control target
= control target key end

     0   :  { %v303_v0 = vmov 0   ;;  %vm144_vm0 = vcmask 719872   ;;  %vm151_vm1 = vcmask 1043456   ;;  %s423_s1 = inlined_call_operand.vmem [shape: bf16[216,128], index: 1, kind: input, shape index: {}]   ;;  %s424_s0 = inlined_call_operand.vmem [shape: bf16[18,216], index: 0, kind: input, shape index: {}]   ;;  %s425_s2 = inlined_call_operand.vmem [shape: f32[1,128], index: 2, kind: input, shape index: {}]   ;;  %s426_s3 = inlined_call_operand.vmem [shape: f32[1,128], index: 3, kind: input, shape index: {}]   ;;  %s427_s4 = inlined_call_operand.vmem [shape: f32[18,128], index: 4, kind: output, shape index: {}]  }
   0x1   :  { %155 = vmatprep.subr.bf16.mxu0 %v303_v0  ;;  %255 = vmatprep.subr.bf16.mxu1 %v303_v0  ;;  %v284_v1 = vld [vmem:[%s423_s1] sm:$0xff]   ;;  %v285_v2 = vld [vmem:[%s423_s1 + $0x8] sm:$0xff]   ;;  %v286_v3 = vld [vmem:[%s423_s1 + $0x10] sm:$0xff]  }
   0x2   :  { %156 = vmatpush1.bf16.msra.mxu0 %v284_v1  ;;  %269 = vmatpush1.bf16.msra.mxu1 %v284_v1  ;;  %v287_v4 = vld [vmem:[%s423_s1 + $0x18] sm:$0xff]   ;;  %v288_v5 = vld [vmem:[%s423_s1 + $0x20] sm:$0xff]   ;;  %v20_v7 = vld [vmem:[%s424_s0 + $0x10] sm:$0x11] }
   0x3   :  { %157 = vmatprep.subr.bf16.mxu0 %v303_v0  ;;  %256 = vmatprep.subr.bf16.mxu1 %v303_v0  ;;  %v300_v6 = vld [vmem:[%s424_s0 + $0x4] ss:$8 sps:$4 sm:$0xff]   ;;  %v236_v8 = vcombine.high %v20_v7, %v20_v7  ;;  %v290_v10 = vld [vmem:[%s423_s1 + $0x30] sm:$0xff]   ;;  %v291_v11 = vld [vmem:[%s423_s1 + $0x38] sm:$0xff]   ;;  %v235_v20 = vcombine.low %v20_v7, %v20_v7 }
   0x4   :  { %251 = vmatprep.mubr.msk.bf16.mxu0 %vm144_vm0, %v300_v6  ;;  %v289_v9 = vld [vmem:[%s423_s1 + $0x28] sm:$0xff]   ;;  %v292_v12 = vld [vmem:[%s423_s1 + $0x40] sm:$0xff]   ;;  %v294_v14 = vld [vmem:[%s423_s1 + $0x50] sm:$0xff]  }
   0x5   :  { %252 = vmatprep.mubr.msk.bf16.mxu1 %vm144_vm0, %v236_v8  ;;  %v293_v13 = vld [vmem:[%s423_s1 + $0x48] sm:$0xff]   ;;  %v295_v15 = vld [vmem:[%s423_s1 + $0x58] sm:$0xff]   ;;  %v296_v16 = vld [vmem:[%s423_s1 + $0x60] sm:$0xff]  }
   0x6   :  { %158 = vmatpush1.bf16.msra.mxu0 %v285_v2  ;;  %270 = vmatpush1.bf16.msra.mxu1 %v285_v2  ;;  %v297_v17 = vld [vmem:[%s423_s1 + $0x68] ss:$0 sps:$4 sm:$0xff]   ;;  %v253_v21 = vld [vmem:[%s425_s2] ss:$0 sm:$0xff] }
   0x7   :  { %159 = vmatprep.subr.bf16.mxu0 %v303_v0  ;;  %257 = vmatprep.subr.bf16.mxu1 %v303_v0  ;;  %v153_v18 = vsel %vm151_vm1, %v297_v17, 0  ;;  %v298_v19 = vld [vmem:[%s424_s0] ss:$8 sps:$4 sm:$0xff]  }
   0x8   :  { %v254_v23 = vld [vmem:[%s426_s3] ss:$0 sm:$0xff] }
   0xa   :  { %160 = vmatpush1.bf16.msra.mxu0 %v286_v3  ;;  %271 = vmatpush1.bf16.msra.mxu1 %v286_v3 }
   0xb   :  { %161 = vmatprep.subr.bf16.mxu0 %v303_v0  ;;  %258 = vmatprep.subr.bf16.mxu1 %v303_v0 }
   0xe   :  { %162 = vmatpush1.bf16.msra.mxu0 %v287_v4  ;;  %272 = vmatpush1.bf16.msra.mxu1 %v287_v4 }
   0xf   :  { %163 = vmatprep.subr.bf16.mxu0 %v303_v0  ;;  %259 = vmatprep.subr.bf16.mxu1 %v303_v0 }
  0x12   :  { %164 = vmatpush1.bf16.msra.mxu0 %v288_v5  ;;  %273 = vmatpush1.bf16.msra.mxu1 %v288_v5 }
  0x13   :  { %165 = vmatprep.subr.bf16.mxu0 %v303_v0  ;;  %260 = vmatprep.subr.bf16.mxu1 %v303_v0 }
  0x16   :  { %166 = vmatpush1.bf16.msra.mxu0 %v289_v9  ;;  %274 = vmatpush1.bf16.msra.mxu1 %v289_v9 }
  0x17   :  { %167 = vmatprep.subr.bf16.mxu0 %v303_v0  ;;  %261 = vmatprep.subr.bf16.mxu1 %v303_v0 }
  0x1a   :  { %168 = vmatpush1.bf16.msra.mxu0 %v290_v10  ;;  %275 = vmatpush1.bf16.msra.mxu1 %v290_v10 }
  0x1b   :  { %169 = vmatprep.subr.bf16.mxu0 %v303_v0  ;;  %262 = vmatprep.subr.bf16.mxu1 %v303_v0 }
  0x1e   :  { %170 = vmatpush1.bf16.msra.mxu0 %v291_v11  ;;  %276 = vmatpush1.bf16.msra.mxu1 %v291_v11 }
  0x1f   :  { %171 = vmatprep.subr.bf16.mxu0 %v303_v0  ;;  %263 = vmatprep.subr.bf16.mxu1 %v303_v0 }
  0x22   :  { %172 = vmatpush1.bf16.msra.mxu0 %v292_v12  ;;  %277 = vmatpush1.bf16.msra.mxu1 %v292_v12 }
  0x23   :  { %173 = vmatprep.subr.bf16.mxu0 %v303_v0  ;;  %264 = vmatprep.subr.bf16.mxu1 %v303_v0 }
  0x26   :  { %174 = vmatpush1.bf16.msra.mxu0 %v293_v13  ;;  %278 = vmatpush1.bf16.msra.mxu1 %v293_v13 }
  0x27   :  { %175 = vmatprep.subr.bf16.mxu0 %v303_v0  ;;  %265 = vmatprep.subr.bf16.mxu1 %v303_v0 }
  0x2a   :  { %176 = vmatpush1.bf16.msra.mxu0 %v294_v14  ;;  %279 = vmatpush1.bf16.msra.mxu1 %v294_v14 }
  0x2b   :  { %177 = vmatprep.subr.bf16.mxu0 %v303_v0  ;;  %266 = vmatprep.subr.bf16.mxu1 %v303_v0 }
  0x2e   :  { %178 = vmatpush1.bf16.msra.mxu0 %v295_v15  ;;  %280 = vmatpush1.bf16.msra.mxu1 %v295_v15 }
  0x2f   :  { %179 = vmatprep.subr.bf16.mxu0 %v303_v0  ;;  %267 = vmatprep.subr.bf16.mxu1 %v303_v0 }
  0x32   :  { %180 = vmatpush1.bf16.msra.mxu0 %v296_v16  ;;  %281 = vmatpush1.bf16.msra.mxu1 %v296_v16 }
  0x33   :  { %181 = vmatprep.subr.bf16.mxu0 %v303_v0  ;;  %268 = vmatprep.subr.bf16.mxu1 %v303_v0 }
  0x36   :  { %182 = vmatpush1.bf16.msra.mxu0 %v153_v18  ;;  %282 = vmatpush1.bf16.msra.mxu1 %v153_v18 }
  0x39   :  { %188 = vmatmul.mubr.bf16.vlgmr.msra.gmra.mrb[0].mxu0 %v298_v19  ;;  %196 = vmatmul.mubr.bf16.vlgmr.msra.gmra.mrb[0].mxu1 %v235_v20 }
 0x10c   :  { %v189_v22 = vpop.f32.mrb[0].mxu0  ;;  %v197_v24 = vpop.f32.mrb[0].mxu1 }
 0x10d   :  { %v210_v25 = vmul.f32 %v253_v21, %v189_v22  ;;  %v212_v26 = vmul.f32 %v253_v21, %v197_v24  ;;  %v191_v27 = vpop.f32.mrb[1].mxu0  ;;  %v199_v28 = vpop.f32.mrb[1].mxu1 }
 0x10e   :  { %v192_v29 = vpop.f32.mrb[2].mxu0  ;;  %v200_v30 = vpop.f32.mrb[2].mxu1 }
 0x10f   :  { %v220_v31 = vadd.f32 %v254_v23, %v210_v25  ;;  %v222_v32 = vadd.f32 %v254_v23, %v212_v26  ;;  %v211_v33 = vmul.f32 %v253_v21, %v192_v29  ;;  %v194_v34 = vpop.f32.mrb[3].mxu0  ;;  %v201_v35 = vpop.f32.mrb[3].mxu1 }
 0x111   :  { %v223_v36 = vmax.f32 %v220_v31, 0.0  ;;  %v225_v37 = vmax.f32 %v222_v32, 0.0  ;;  %v221_v38 = vadd.f32 %v254_v23, %v211_v33 }
 0x113   :  { %226 = vst [vmem:[%s427_s4] sm:$0xff] %v223_v36  ;;  %228 = vst [vmem:[%s427_s4 + $0x10] sm:$0x3] %v225_v37  ;;  %v224_v39 = vmax.f32 %v221_v38, 0.0 }
 0x115   :  { %227 = vst [vmem:[%s427_s4 + $0x8] sm:$0xff] %v224_v39 }

// kernel: ssrn_forward.18
= control target key start
LH: loop header
LB: loop body
LE: loop exit
PB: predicated region body
PF: predicated region fallthrough
CT: control target
= control target key end

     0   :  { %v312_v0 = vmov 0   ;;  %vm147_vm0 = vcmask 719872   ;;  %vm154_vm1 = vcmask 1043456   ;;  %s446_s1 = inlined_call_operand.vmem [shape: bf16[216,128], index: 1, kind: input, shape index: {}]   ;;  %s447_s0 = inlined_call_operand.vmem [shape: bf16[18,216], index: 0, kind: input, shape index: {}]   ;;  %s448_s2 = inlined_call_operand.vmem [shape: f32[1,128], index: 2, kind: input, shape index: {}]   ;;  %s449_s3 = inlined_call_operand.vmem [shape: f32[1,128], index: 3, kind: input, shape index: {}]   ;;  %s450_s4 = inlined_call_operand.vmem [shape: f32[18,128], index: 4, kind: input, shape index: {}]   ;;  %s451_s5 = inlined_call_operand.vmem [shape: f32[18,128], index: 5, kind: output, shape index: {}]  }
   0x1   :  { %158 = vmatprep.subr.bf16.mxu0 %v312_v0  ;;  %264 = vmatprep.subr.bf16.mxu1 %v312_v0  ;;  %v293_v1 = vld [vmem:[%s446_s1] sm:$0xff]   ;;  %v294_v2 = vld [vmem:[%s446_s1 + $0x8] sm:$0xff]   ;;  %v295_v3 = vld [vmem:[%s446_s1 + $0x10] sm:$0xff]  }
   0x2   :  { %159 = vmatpush1.bf16.msra.mxu0 %v293_v1  ;;  %278 = vmatpush1.bf16.msra.mxu1 %v293_v1  ;;  %v296_v4 = vld [vmem:[%s446_s1 + $0x18] sm:$0xff]   ;;  %v297_v5 = vld [vmem:[%s446_s1 + $0x20] sm:$0xff]   ;;  %v23_v7 = vld [vmem:[%s447_s0 + $0x10] sm:$0x11] }
   0x3   :  { %160 = vmatprep.subr.bf16.mxu0 %v312_v0  ;;  %265 = vmatprep.subr.bf16.mxu1 %v312_v0  ;;  %v309_v6 = vld [vmem:[%s447_s0 + $0x4] ss:$8 sps:$4 sm:$0xff]   ;;  %v245_v8 = vcombine.high %v23_v7, %v23_v7  ;;  %v299_v10 = vld [vmem:[%s446_s1 + $0x30] sm:$0xff]   ;;  %v300_v11 = vld [vmem:[%s446_s1 + $0x38] sm:$0xff]   ;;  %v244_v20 = vcombine.low %v23_v7, %v23_v7 }
   0x4   :  { %260 = vmatprep.mubr.msk.bf16.mxu0 %vm147_vm0, %v309_v6  ;;  %v298_v9 = vld [vmem:[%s446_s1 + $0x28] sm:$0xff]   ;;  %v301_v12 = vld [vmem:[%s446_s1 + $0x40] sm:$0xff]   ;;  %v303_v14 = vld [vmem:[%s446_s1 + $0x50] sm:$0xff]  }
   0x5   :  { %261 = vmatprep.mubr.msk.bf16.mxu1 %vm147_vm0, %v245_v8  ;;  %v302_v13 = vld [vmem:[%s446_s1 + $0x48] sm:$0xff]   ;;  %v304_v15 = vld [vmem:[%s446_s1 + $0x58] sm:$0xff]   ;;  %v305_v16 = vld [vmem:[%s446_s1 + $0x60] sm:$0xff]  }
   0x6   :  { %161 = vmatpush1.bf16.msra.mxu0 %v294_v2  ;;  %279 = vmatpush1.bf16.msra.mxu1 %v294_v2  ;;  %v306_v17 = vld [vmem:[%s446_s1 + $0x68] ss:$0 sps:$4 sm:$0xff]   ;;  %v262_v21 = vld [vmem:[%s448_s2] ss:$0 sm:$0xff]  ;;  %v231_v37 = vld [vmem:[%s450_s4 + $0x10] sm:$0x3] }
   0x7   :  { %162 = vmatprep.subr.bf16.mxu0 %v312_v0  ;;  %266 = vmatprep.subr.bf16.mxu1 %v312_v0  ;;  %v156_v18 = vsel %vm154_vm1, %v306_v17, 0  ;;  %v307_v19 = vld [vmem:[%s447_s0] ss:$8 sps:$4 sm:$0xff]  }
   0x8   :  { %v263_v23 = vld [vmem:[%s449_s3] ss:$0 sm:$0xff]  ;;  %v230_v41 = vld [vmem:[%s450_s4 + $0x8] sm:$0xff] }
   0x9   :  { %v229_v36 = vld [vmem:[%s450_s4] sm:$0xff] }
   0xa   :  { %163 = vmatpush1.bf16.msra.mxu0 %v295_v3  ;;  %280 = vmatpush1.bf16.msra.mxu1 %v295_v3 }
   0xb   :  { %164 = vmatprep.subr.bf16.mxu0 %v312_v0  ;;  %267 = vmatprep.subr.bf16.mxu1 %v312_v0 }
   0xe   :  { %165 = vmatpush1.bf16.msra.mxu0 %v296_v4  ;;  %281 = vmatpush1.bf16.msra.mxu1 %v296_v4 }
   0xf   :  { %166 = vmatprep.subr.bf16.mxu0 %v312_v0  ;;  %268 = vmatprep.subr.bf16.mxu1 %v312_v0 }
  0x12   :  { %167 = vmatpush1.bf16.msra.mxu0 %v297_v5  ;;  %282 = vmatpush1.bf16.msra.mxu1 %v297_v5 }
  0x13   :  { %168 = vmatprep.subr.bf16.mxu0 %v312_v0  ;;  %269 = vmatprep.subr.bf16.mxu1 %v312_v0 }
  0x16   :  { %169 = vmatpush1.bf16.msra.mxu0 %v298_v9  ;;  %283 = vmatpush1.bf16.msra.mxu1 %v298_v9 }
  0x17   :  { %170 = vmatprep.subr.bf16.mxu0 %v312_v0  ;;  %270 = vmatprep.subr.bf16.mxu1 %v312_v0 }
  0x1a   :  { %171 = vmatpush1.bf16.msra.mxu0 %v299_v10  ;;  %284 = vmatpush1.bf16.msra.mxu1 %v299_v10 }
  0x1b   :  { %172 = vmatprep.subr.bf16.mxu0 %v312_v0  ;;  %271 = vmatprep.subr.bf16.mxu1 %v312_v0 }
  0x1e   :  { %173 = vmatpush1.bf16.msra.mxu0 %v300_v11  ;;  %285 = vmatpush1.bf16.msra.mxu1 %v300_v11 }
  0x1f   :  { %174 = vmatprep.subr.bf16.mxu0 %v312_v0  ;;  %272 = vmatprep.subr.bf16.mxu1 %v312_v0 }
  0x22   :  { %175 = vmatpush1.bf16.msra.mxu0 %v301_v12  ;;  %286 = vmatpush1.bf16.msra.mxu1 %v301_v12 }
  0x23   :  { %176 = vmatprep.subr.bf16.mxu0 %v312_v0  ;;  %273 = vmatprep.subr.bf16.mxu1 %v312_v0 }
  0x26   :  { %177 = vmatpush1.bf16.msra.mxu0 %v302_v13  ;;  %287 = vmatpush1.bf16.msra.mxu1 %v302_v13 }
  0x27   :  { %178 = vmatprep.subr.bf16.mxu0 %v312_v0  ;;  %274 = vmatprep.subr.bf16.mxu1 %v312_v0 }
  0x2a   :  { %179 = vmatpush1.bf16.msra.mxu0 %v303_v14  ;;  %288 = vmatpush1.bf16.msra.mxu1 %v303_v14 }
  0x2b   :  { %180 = vmatprep.subr.bf16.mxu0 %v312_v0  ;;  %275 = vmatprep.subr.bf16.mxu1 %v312_v0 }
  0x2e   :  { %181 = vmatpush1.bf16.msra.mxu0 %v304_v15  ;;  %289 = vmatpush1.bf16.msra.mxu1 %v304_v15 }
  0x2f   :  { %182 = vmatprep.subr.bf16.mxu0 %v312_v0  ;;  %276 = vmatprep.subr.bf16.mxu1 %v312_v0 }
  0x32   :  { %183 = vmatpush1.bf16.msra.mxu0 %v305_v16  ;;  %290 = vmatpush1.bf16.msra.mxu1 %v305_v16 }
  0x33   :  { %184 = vmatprep.subr.bf16.mxu0 %v312_v0  ;;  %277 = vmatprep.subr.bf16.mxu1 %v312_v0 }
  0x36   :  { %185 = vmatpush1.bf16.msra.mxu0 %v156_v18  ;;  %291 = vmatpush1.bf16.msra.mxu1 %v156_v18 }
  0x39   :  { %191 = vmatmul.mubr.bf16.vlgmr.msra.gmra.mrb[0].mxu0 %v307_v19  ;;  %199 = vmatmul.mubr.bf16.vlgmr.msra.gmra.mrb[0].mxu1 %v244_v20 }
 0x10c   :  { %v192_v22 = vpop.f32.mrb[0].mxu0  ;;  %v200_v24 = vpop.f32.mrb[0].mxu1 }
 0x10d   :  { %v213_v25 = vmul.f32 %v262_v21, %v192_v22  ;;  %v215_v26 = vmul.f32 %v262_v21, %v200_v24  ;;  %v194_v27 = vpop.f32.mrb[1].mxu0  ;;  %v202_v28 = vpop.f32.mrb[1].mxu1 }
 0x10e   :  { %v195_v29 = vpop.f32.mrb[2].mxu0  ;;  %v203_v30 = vpop.f32.mrb[2].mxu1 }
 0x10f   :  { %v223_v31 = vadd.f32 %v263_v23, %v213_v25  ;;  %v225_v32 = vadd.f32 %v263_v23, %v215_v26  ;;  %v214_v33 = vmul.f32 %v262_v21, %v195_v29  ;;  %v197_v34 = vpop.f32.mrb[3].mxu0  ;;  %v204_v35 = vpop.f32.mrb[3].mxu1 }
 0x111   :  { %v226_v38 = vmax.f32 %v223_v31, 0.0  ;;  %v228_v39 = vmax.f32 %v225_v32, 0.0  ;;  %v224_v40 = vadd.f32 %v263_v23, %v214_v33 }
 0x113   :  { %v232_v42 = vadd.f32 %v229_v36, %v226_v38  ;;  %v234_v43 = vadd.f32 %v231_v37, %v228_v39  ;;  %v227_v44 = vmax.f32 %v224_v40, 0.0 }
 0x115   :  { %235 = vst [vmem:[%s451_s5] sm:$0xff] %v232_v42  ;;  %237 = vst [vmem:[%s451_s5 + $0x10] sm:$0x3] %v234_v43  ;;  %v233_v45 = vadd.f32 %v230_v41, %v227_v44 }
 0x117   :  { %236 = vst [vmem:[%s451_s5 + $0x8] sm:$0xff] %v233_v45 }

// kernel: ssrn_forward.19
= control target key start
LH: loop header
LB: loop body
LE: loop exit
PB: predicated region body
PF: predicated region fallthrough
CT: control target
= control target key end

     0   :  { %v277_v1 = vmov 0   ;;  %v63_v5 = vlaneseq  ;;  %v278_v8 = vmov 1966171168   ;;  %s360_s0 = inlined_call_operand.vmem [shape: bf16[2,216], index: 0, kind: input, shape index: {}]   ;;  %s361_s1 = inlined_call_operand.vmem [shape: bf16[216,128], index: 1, kind: input, shape index: {}]   ;;  %s362_s2 = inlined_call_operand.vmem [shape: f32[1,128], index: 2, kind: input, shape index: {}]   ;;  %s363_s3 = inlined_call_operand.hbm [shape: f32[2,128], index: 3, kind: output, shape index: {}]  }
   0x1   :  { %v239_v0 = vld [vmem:[%s361_s1] sm:$0xff]   ;;  %164 = vmatprep.subr.bf16.mxu0 %v277_v1  ;;  %v240_v2 = vld [vmem:[%s361_s1 + $0x8] sm:$0xff]   ;;  %v241_v3 = vld [vmem:[%s361_s1 + $0x10] sm:$0xff]   ;;  %v61_v9 = vunpack.c.l.s4 %v278_v8 }
   0x2   :  { %165 = vmatpush1.bf16.msra.mxu0 %v239_v0  ;;  %v242_v4 = vld [vmem:[%s361_s1 + $0x18] sm:$0xff]   ;;  %v243_v6 = vld [vmem:[%s361_s1 + $0x20] sm:$0xff]   ;;  %v64_v10 = vshrl.u32 %v63_v5, 7 }
   0x3   :  { %166 = vmatprep.subr.bf16.mxu0 %v277_v1  ;;  %v220_v7 = vld.sshfl [vmem:[%s360_s0] sm:$0x11 pattern:$0x75316420] }
   0x6   :  { %167 = vmatpush1.bf16.msra.mxu0 %v240_v2 }
   0x7   :  { %168 = vmatprep.subr.bf16.mxu0 %v277_v1 }
   0xa   :  { %169 = vmatpush1.bf16.msra.mxu0 %v241_v3 }
   0xb   :  { %170 = vmatprep.subr.bf16.mxu0 %v277_v1 }
   0xe   :  { %171 = vmatpush1.bf16.msra.mxu0 %v242_v4 }
   0xf   :  { %172 = vmatprep.subr.bf16.mxu0 %v277_v1 }
  0x10   :  { %8 = vsyncpa [#allocation3], 0  ;;  %v59_v11 = vcombine.high %v220_v7, %v220_v7  ;;  %v62_v12 = vunpack.c.0.s8 %v61_v9  ;;  %v244_v13 = vld [vmem:[%s361_s1 + $0x28] sm:$0xff]   ;;  %vm156_vm0 = vcmask 719872   ;;  %v245_v16 = vld [vmem:[%s361_s1 + $0x30] sm:$0xff]   ;;  %vm160_vm1 = vcmask 1043456  }
  0x11   :  { %v246_v17 = vld [vmem:[%s361_s1 + $0x38] sm:$0xff]   ;;  %v247_v18 = vld [vmem:[%s361_s1 + $0x40] sm:$0xff]   ;;  %v248_v19 = vld [vmem:[%s361_s1 + $0x48] sm:$0xff]   ;;  %s279_s16 = smov [#allocation2]  }
  0x12   :  { %173 = vmatpush1.bf16.msra.mxu0 %v243_v6  ;;  %v65_v14 = vsub.s32 %v62_v12, %v64_v10  ;;  %v249_v20 = vld [vmem:[%s361_s1 + $0x50] sm:$0xff]   ;;  %v250_v21 = vld [vmem:[%s361_s1 + $0x58] sm:$0xff]   ;;  %v251_v22 = vld [vmem:[%s361_s1 + $0x60] sm:$0xff]   ;;  %s211_s17 = sshll.u32 %s279_s16, 4  ;;  %s212_s17 = int_to_ptr.vmem [resolvable:$true] %s211_s17 }
  0x13   :  { %174 = vmatprep.subr.bf16.mxu0 %v277_v1  ;;  %v252_v23 = vld [vmem:[%s361_s1 + $0x68] ss:$0 sps:$4 sm:$0xff]   ;;  %v219_v26 = vld [vmem:[%s362_s2] ss:$0 sm:$0xff]  ;;  %s253_s1 = scalar_lea.vmem %s212_s17, 32  ;;  %p258_p1 = scmp.lt.s32.totalorder %s212_s17, %s212_s17 }
  0x14   :  { %v73_v15 = vrot.slane %v59_v11, %v65_v14  ;;  %v162_v24 = vsel %vm160_vm1, %v252_v23, 0  ;;  %v66_v25 = vrot.slane %v220_v7, %v65_v14  ;;  %p254_p0 = scmp.ne.s32.totalorder %s212_s17, %s253_s1  ;;  %p259_p2 = scmp.lt.s32.totalorder %s253_s1, %s253_s1 }
  0x16   :  { %175 = vmatpush1.bf16.msra.mxu0 %v244_v13  ;;  %235 = vmatprep.mubr.msk.bf16.mxu0 %vm156_vm0, %v73_v15  ;;  %p260_p3 = por %p259_p2, %p258_p1 }
  0x17   :  { %176 = vmatprep.subr.bf16.mxu0 %v277_v1 }
  0x18   :  { %p261_p4 = pnand %p260_p3, %p254_p0 }
  0x1a   :  { %177 = vmatpush1.bf16.msra.mxu0 %v245_v16 }
  0x1b   :  { %178 = vmatprep.subr.bf16.mxu0 %v277_v1 }
  0x1e   :  { %179 = vmatpush1.bf16.msra.mxu0 %v246_v17 }
  0x1f   :  { %180 = vmatprep.subr.bf16.mxu0 %v277_v1 }
  0x22   :  { %181 = vmatpush1.bf16.msra.mxu0 %v247_v18 }
  0x23   :  { %182 = vmatprep.subr.bf16.mxu0 %v277_v1 }
  0x26   :  { %183 = vmatpush1.bf16.msra.mxu0 %v248_v19 }
  0x27   :  { %184 = vmatprep.subr.bf16.mxu0 %v277_v1 }
  0x2a   :  { %185 = vmatpush1.bf16.msra.mxu0 %v249_v20 }
  0x2b   :  { %186 = vmatprep.subr.bf16.mxu0 %v277_v1 }
  0x2e   :  { %187 = vmatpush1.bf16.msra.mxu0 %v250_v21 }
  0x2f   :  { %188 = vmatprep.subr.bf16.mxu0 %v277_v1 }
  0x32   :  { %189 = vmatpush1.bf16.msra.mxu0 %v251_v22 }
  0x33   :  { %190 = vmatprep.subr.bf16.mxu0 %v277_v1 }
  0x36   :  { %191 = vmatpush1.bf16.msra.mxu0 %v162_v24 }
  0x39   :  { %197 = vmatmul.mubr.bf16.vlgmr.msra.gmra.mrb[0].mxu0 %v66_v25 }
 0x10c   :  { %v198_v27 = vpop.f32.mrb[0].mxu0 }
 0x10d   :  { %v199_v28 = vadd.f32 %v219_v26, %v198_v27  ;;  %v200_v29 = vpop.f32.mrb[1].mxu0 }
 0x10e   :  { %v201_v30 = vpop.f32.mrb[2].mxu0 }
 0x10f   :  { %204 = vst [vmem:[#allocation2] sm:$0x3] %v199_v28  ;;  %v202_v31 = vpop.f32.mrb[3].mxu0 }
 0x110   :  { %264 = shalt.err (!%p261_p4)
}
 0x111   :  { %s265_s2 = scalar_lea.hbm %s363_s3, 32 }
 0x112   :  { %p266_p5 = scmp.ne.s32.totalorder %s363_s3, %s265_s2  ;;  %p269_p6 = scmp.lt.u32.totalorder %s265_s2, %s363_s3 }
 0x114   :  { %p271_p7 = pnand %p269_p6, %p266_p5 }
 0x116   :  { %274 = shalt.err (!%p271_p7)
}
 0x117   :  { %214 = dma.vmem_to_hbm [thread:$0]  %s212_s17, 32, %s363_s3, [#allocation3]  }
 0x118   :  { %275 = dma.done.wait [#allocation3], 32  }
 0x119   :  { %276 = vsyncadd [#allocation3], 4294967264 }
 0x11a   :  { %218 = vsyncpa [#allocation3], 1 }

</bundles_post_ra>
